<compile_context>
chip_gen: v7x
topology: tpu7x:2x2x1
jax: 0.10.0
libtpu: 0.0.40
codegen_flags: <defaults>
</compile_context>

<pallas_src>
import functools

import jax
import jax.numpy as jnp
from jax.experimental import pallas as pl
from jax.experimental.pallas import tpu as pltpu

BN_EPS = 1e-5
_OUT_DIM = 10
_OUT_PAD = 128                      # lane-dense final block; sliced back to 10 in wrapper
_NEG_BIG = -1e9                     # "minus infinity" for the padded logit lanes
_VMEM_LIMIT = 32 * 1024 * 1024      # fits v5e (128 MiB), v6e (128 MiB), v7x (64 MiB)


def _round_up(x, m):
    return (x + m - 1) // m * m


def _pick_tile_m():
    """Row-tile: 128 on v5e (128x128 MXU, 16 MiB scoped-VMEM default), 256 on v6e/v7x."""
    try:
        kind = jax.devices()[0].device_kind.lower()
    except Exception:
        return 256
    if "v5 lite" in kind or "v5lite" in kind or "v5e" in kind:
        return 128
    return 256


def _hswish(z):
    # F.relu6(x + 3) / 6 * x
    return jnp.clip(z + 3.0, 0.0, 6.0) * (1.0 / 6.0) * z


# ----------------------------------------------------------------------------
# Pallas kernels
# ----------------------------------------------------------------------------
def _conv_block_kernel(p_ref, w_ref, b_ref, o_ref, *, act):
    """One conv block as a patch-matmul: (TILE_M, K*K*Cin) @ (K*K*Cin, Cout).

    bf16 operands, f32 MXU accumulation; bias already has BN folded in.
    """
    z = jnp.dot(p_ref[...], w_ref[...], preferred_element_type=jnp.float32)
    z = z + b_ref[...]
    if act == "relu":
        z = jnp.maximum(z, 0.0)
    elif act == "hswish":
        z = _hswish(z)
    o_ref[...] = z.astype(o_ref.dtype)


def _head_kernel(x_ref, w4_ref, b4_ref, wd1_ref, bd1_ref, wd0_ref, bd0_ref, o_ref):
    """Conv5x5-as-dense (1200->108, BN folded) + hswish, dense_1 + hswish,
    dense_0 (padded to 128 lanes) + log-softmax."""
    h = jnp.dot(x_ref[...], w4_ref[...], preferred_element_type=jnp.float32) + b4_ref[...]
    h = _hswish(h).astype(jnp.bfloat16)
    h = jnp.dot(h, wd1_ref[...], preferred_element_type=jnp.float32) + bd1_ref[...]
    h = _hswish(h).astype(jnp.bfloat16)
    # TODO(synk): nn.Dropout(p ~ U(0.125,0.375), training) -> identity (eval mode).
    logits = jnp.dot(h, wd0_ref[...], preferred_element_type=jnp.float32) + bd0_ref[...]
    m = jnp.max(logits, axis=1, keepdims=True)
    lse = jnp.log(jnp.sum(jnp.exp(logits - m), axis=1, keepdims=True)) + m
    o_ref[...] = logits - lse


# ----------------------------------------------------------------------------
# pallas_call wrappers (row-tiled grid, resident weights)
# ----------------------------------------------------------------------------
def _conv_block(patches, w, b, act, tile_m):
    m, kp = patches.shape
    cout = w.shape[1]
    tile = min(tile_m, _round_up(m, 8))
    m_pad = _round_up(m, tile)
    if m_pad != m:
        patches = jnp.pad(patches, ((0, m_pad - m), (0, 0)))
    cost = pl.CostEstimate(
        flops=2 * m_pad * kp * cout,
        transcendentals=0,
        bytes_accessed=m_pad * kp * 2 + kp * cout * 2 + cout * 4 + m_pad * cout * 2)
    out = pl.pallas_call(
        functools.partial(_conv_block_kernel, act=act),
        out_shape=jax.ShapeDtypeStruct((m_pad, cout), jnp.bfloat16),
        grid=(m_pad // tile,),
        in_specs=[
            pl.BlockSpec((tile, kp), lambda i: (i, 0)),     # pipelined row tiles
            pl.BlockSpec((kp, cout), lambda i: (0, 0)),     # weight: VMEM-resident
            pl.BlockSpec((1, cout), lambda i: (0, 0)),      # folded BN/bias: resident
        ],
        out_specs=pl.BlockSpec((tile, cout), lambda i: (i, 0)),
        compiler_params=pltpu.CompilerParams(
            dimension_semantics=("parallel",),              # megacore split on v7x
            vmem_limit_bytes=_VMEM_LIMIT),
        cost_estimate=cost,
    )(patches, w, b)
    return out[:m]


def _head(feat, p, tile_m):
    bsz, d_in = feat.shape
    d_mid = p["w4"].shape[1]
    tile = min(tile_m, _round_up(bsz, 8))
    b_pad = _round_up(bsz, tile)
    if b_pad != bsz:
        feat = jnp.pad(feat, ((0, b_pad - bsz), (0, 0)))
    w_elems = d_in * d_mid + d_mid * d_mid + d_mid * _OUT_PAD
    cost = pl.CostEstimate(
        flops=2 * b_pad * w_elems,
        transcendentals=b_pad * _OUT_PAD,
        bytes_accessed=b_pad * d_in * 2 + w_elems * 2 + b_pad * _OUT_PAD * 4)
    out = pl.pallas_call(
        _head_kernel,
        out_shape=jax.ShapeDtypeStruct((b_pad, _OUT_PAD), jnp.float32),
        grid=(b_pad // tile,),
        in_specs=[
            pl.BlockSpec((tile, d_in), lambda i: (i, 0)),
            pl.BlockSpec((d_in, d_mid), lambda i: (0, 0)),
            pl.BlockSpec((1, d_mid), lambda i: (0, 0)),
            pl.BlockSpec((d_mid, d_mid), lambda i: (0, 0)),
            pl.BlockSpec((1, d_mid), lambda i: (0, 0)),
            pl.BlockSpec((d_mid, _OUT_PAD), lambda i: (0, 0)),
            pl.BlockSpec((1, _OUT_PAD), lambda i: (0, 0)),
        ],
        out_specs=pl.BlockSpec((tile, _OUT_PAD), lambda i: (i, 0)),
        compiler_params=pltpu.CompilerParams(
            dimension_semantics=("parallel",),
            vmem_limit_bytes=_VMEM_LIMIT),
        cost_estimate=cost,
    )(feat, p["w4"], p["b4"], p["wd1"], p["bd1"], p["wd0"], p["bd0"])
    return out[:bsz, :_OUT_DIM]


# ----------------------------------------------------------------------------
# Wrapper glue: im2col (pure static slicing) + forward pipeline
# ----------------------------------------------------------------------------
def _extract_patches(x, k, stride):
    """x: (B, H, W, C) -> (B*Ho*Wo, k*k*C); feature order (kh, kw, c), matching
    HWIO-flattened weights.  Pure data movement (wrapper glue)."""
    bsz, h, w, c = x.shape
    ho = (h - k) // stride + 1
    wo = (w - k) // stride + 1
    cols = []
    for u in range(k):
        for v in range(k):
            cols.append(x[:, u::stride, v::stride, :][:, :ho, :wo, :])
    patches = jnp.stack(cols, axis=3)                  # (B, Ho, Wo, k*k, C)
    return patches.reshape(bsz * ho * wo, k * k * c)


def conv2dnet_forward(x_nchw, p):
    assert x_nchw.shape[1:] == (1, 28, 28), x_nchw.shape
    bsz = x_nchw.shape[0]
    tile_m = _pick_tile_m()
    x = jnp.transpose(x_nchw, (0, 2, 3, 1)).astype(jnp.bfloat16)   # NHWC (B,28,28,1)

    # convs[0:2]  Conv2d(1,32,3,1,bias) + ReLU                     -> (B,26,26,32)
    a = _conv_block(_extract_patches(x, 3, 1), p["w1"], p["b1"], "relu", tile_m)
    a = a.reshape(bsz, 26, 26, 32)
    # convs[2]    Conv2d(32,32,3)+BN+AvgPool2+ReLU == folded Conv4x4/s2 + ReLU -> (B,12,12,32)
    a = _conv_block(_extract_patches(a, 4, 2), p["w2"], p["b2"], "relu", tile_m)
    a = a.reshape(bsz, 12, 12, 32)
    # convs[3]    Conv2d(32,48,3)+BN+AvgPool2+ReLU == folded Conv4x4/s2 + ReLU -> (B,5,5,48)
    a = _conv_block(_extract_patches(a, 4, 2), p["w3"], p["b3"], "relu", tile_m)
    a = a.reshape(bsz, 5, 5, 48)
    # convs[4:7] Conv2d(48,108,5,bias)+BN+hswish on a 5x5 map == dense(1200->108);
    # fused with flatten, dense_1 and dense_0(+LogSoftmax) in the head kernel.
    feat = a.reshape(bsz, 5 * 5 * 48)
    return _head(feat, p, tile_m)


# ----------------------------------------------------------------------------
# Parameter setup (PyTorch-layout params) + folding into kernel-ready params
# ----------------------------------------------------------------------------
def init_torch_params(key):
    ks = jax.random.split(key, 24)
    it = iter(range(24))

    def nrm(shape, scale):
        return scale * jax.random.normal(ks[next(it)], shape, jnp.float32)

    def uni(shape, lo, hi):
        return jax.random.uniform(ks[next(it)], shape, jnp.float32, lo, hi)

    p = {}
    p["conv1_w"] = nrm((32, 1, 3, 3), 1.0 / 3.0)          # OIHW
    p["conv1_b"] = nrm((32,), 0.1)
    p["conv2_w"] = nrm((32, 32, 3, 3), (32 * 9) ** -0.5)
    p["conv3_w"] = nrm((48, 32, 3, 3), (32 * 9) ** -0.5)
    p["conv4_w"] = nrm((108, 48, 5, 5), (48 * 25) ** -0.5)
    p["conv4_b"] = nrm((108,), 0.1)
    for name, c in (("bn2", 32), ("bn3", 48), ("bn4", 108)):
        p[name + "_gamma"] = uni((c,), 0.8, 1.2)
        p[name + "_beta"] = nrm((c,), 0.05)
        p[name + "_mean"] = nrm((c,), 0.05)
        p[name + "_var"] = uni((c,), 0.8, 1.2)
    p["d1_w"] = nrm((108, 108), 108 ** -0.5)              # torch Linear: (out, in)
    p["d1_b"] = nrm((108,), 0.1)
    p["d0_w"] = nrm((10, 108), 108 ** -0.5)
    p["d0_b"] = nrm((10,), 0.1)
    return p


def _bn_scale_shift(p, name):
    s = p[name + "_gamma"] / jnp.sqrt(p[name + "_var"] + BN_EPS)
    t = p[name + "_beta"] - p[name + "_mean"] * s
    return s, t


def _fold_conv_bn_pool(w_oihw, s, t):
    """Conv3x3(s1, no bias) -> BN(eval) -> AvgPool2d(2)  ==  Conv4x4(s2) with an
    effective kernel.  Returns HWIO-flattened weight (16*Cin, Cout) and bias."""
    w = jnp.transpose(w_oihw, (2, 3, 1, 0)) * s           # HWIO, BN scale per Cout
    k, _, cin, cout = w.shape
    w_eff = jnp.zeros((k + 1, k + 1, cin, cout), jnp.float32)
    for a in (0, 1):
        for b in (0, 1):
            w_eff = w_eff.at[a:a + k, b:b + k].add(0.25 * w)
    return w_eff.reshape((k + 1) * (k + 1) * cin, cout), t.reshape(1, cout)


def prepare_params(p):
    """Fold BN / AvgPool / the 5x5 conv-as-dense into matmul weights, pad the
    classifier to lane-dense 128 columns, cast matmul operands to bf16."""
    fp = {}
    fp["w1"] = jnp.transpose(p["conv1_w"], (2, 3, 1, 0)).reshape(9, 32)
    fp["b1"] = p["conv1_b"].reshape(1, 32)
    s2, t2 = _bn_scale_shift(p, "bn2")
    fp["w2"], fp["b2"] = _fold_conv_bn_pool(p["conv2_w"], s2, t2)
    s3, t3 = _bn_scale_shift(p, "bn3")
    fp["w3"], fp["b3"] = _fold_conv_bn_pool(p["conv3_w"], s3, t3)
    s4, t4 = _bn_scale_shift(p, "bn4")
    fp["w4"] = (jnp.transpose(p["conv4_w"], (2, 3, 1, 0)) * s4).reshape(5 * 5 * 48, 108)
    fp["b4"] = (p["conv4_b"] * s4 + t4).reshape(1, 108)
    fp["wd1"] = p["d1_w"].T
    fp["bd1"] = p["d1_b"].reshape(1, 108)
    wd0 = jnp.zeros((108, _OUT_PAD), jnp.float32).at[:, :_OUT_DIM].set(p["d0_w"].T)
    bd0 = jnp.full((_OUT_PAD,), _NEG_BIG, jnp.float32).at[:_OUT_DIM].set(p["d0_b"])
    fp["wd0"] = wd0
    fp["bd0"] = bd0.reshape(1, _OUT_PAD)
    for k in ("w1", "w2", "w3", "w4", "wd1", "wd0"):      # bf16 MXU operands
        fp[k] = fp[k].astype(jnp.bfloat16)
    return fp                                             # biases stay f32


# ----------------------------------------------------------------------------
# References
# ----------------------------------------------------------------------------
def reference_forward(x_nchw, p):
    """Full-f32 reference with the ORIGINAL (unfolded) params; PyTorch eval semantics."""
    x = x_nchw.astype(jnp.float32)

    def conv(x, w, b=None, stride=1):
        y = jax.lax.conv_general_dilated(x, w, (stride, stride), "VALID",
                                         dimension_numbers=("NCHW", "OIHW", "NCHW"))
        return y if b is None else y + b.reshape(1, -1, 1, 1)

    def bn(x, name):
        s = p[name + "_gamma"] / jnp.sqrt(p[name + "_var"] + BN_EPS)
        t = p[name + "_beta"] - p[name + "_mean"] * s
        return x * s.reshape(1, -1, 1, 1) + t.reshape(1, -1, 1, 1)

    def avgpool2(x):
        return jax.lax.reduce_window(x, 0.0, jax.lax.add,
                                     (1, 1, 2, 2), (1, 1, 2, 2), "VALID") * 0.25

    x = jnp.maximum(conv(x, p["conv1_w"], p["conv1_b"]), 0.0)
    x = jnp.maximum(avgpool2(bn(conv(x, p["conv2_w"]), "bn2")), 0.0)
    x = jnp.maximum(avgpool2(bn(conv(x, p["conv3_w"]), "bn3")), 0.0)
    x = _hswish(bn(conv(x, p["conv4_w"], p["conv4_b"]), "bn4"))
    x = x.reshape(x.shape[0], -1)                          # (B, 108)
    x = _hswish(x @ p["d1_w"].T + p["d1_b"])
    logits = x @ p["d0_w"].T + p["d0_b"]                   # Dropout: identity (eval)
    return jax.nn.log_softmax(logits, axis=1)


def folded_reference_forward(x_nchw, fp):
    """Same folded/bf16 math as the Pallas path, in plain XLA (checks the lowering)."""
    bsz = x_nchw.shape[0]
    x = jnp.transpose(x_nchw, (0, 2, 3, 1)).astype(jnp.bfloat16)

    def mm(pch, w, b, act):
        z = jnp.dot(pch, w, preferred_element_type=jnp.float32) + b
        return jnp.maximum(z, 0.0) if act == "relu" else _hswish(z)

    a = mm(_extract_patches(x, 3, 1), fp["w1"], fp["b1"], "relu")
    a = a.astype(jnp.bfloat16).reshape(bsz, 26, 26, 32)
    a = mm(_extract_patches(a, 4, 2), fp["w2"], fp["b2"], "relu")
    a = a.astype(jnp.bfloat16).reshape(bsz, 12, 12, 32)
    a = mm(_extract_patches(a, 4, 2), fp["w3"], fp["b3"], "relu")
    a = a.astype(jnp.bfloat16).reshape(bsz, 5, 5, 48)
    h = mm(a.reshape(bsz, 5 * 5 * 48), fp["w4"], fp["b4"], "hswish").astype(jnp.bfloat16)
    h = mm(h, fp["wd1"], fp["bd1"], "hswish").astype(jnp.bfloat16)
    logits = jnp.dot(h, fp["wd0"], preferred_element_type=jnp.float32) + fp["bd0"]
    return jax.nn.log_softmax(logits, axis=1)[:, :_OUT_DIM]


if __name__ == "__main__":
    key = jax.random.PRNGKey(0)
    k_param, k_x = jax.random.split(key)

    torch_params = init_torch_params(k_param)
    pallas_params = prepare_params(torch_params)

    x = jax.random.normal(k_x, (8, 1, 28, 28), dtype=jnp.float32)   # MNIST-like NCHW

    out = jax.block_until_ready(jax.jit(conv2dnet_forward)(x, pallas_params))
    assert out.shape == (8, _OUT_DIM), out.shape

    # Tight check: same folded/bf16 math in plain XLA (validates the Pallas lowering).
    ref_folded = jax.block_until_ready(folded_reference_forward(x, pallas_params))
    err_folded = float(jnp.max(jnp.abs(out - ref_folded)))
    assert err_folded < 1e-2, f"folded-reference mismatch: {err_folded}"

    # Loose check: full-f32 unfolded PyTorch-semantics reference (validates the
    # BN/AvgPool/conv-as-dense folding; residual diff is bf16 rounding only).
    ref_f32 = jax.block_until_ready(reference_forward(x, torch_params))
    err_f32 = float(jnp.max(jnp.abs(out - ref_f32)))
    assert err_f32 < 0.2, f"f32-reference mismatch: {err_f32}"

    print("KERNEL_OK")
</pallas_src>

<mosaic_0001>
module attributes {stable_mosaic.version = 11 : i64} {
  func.func @_conv_block_kernel(%arg0: i32, %arg1: memref<256x9xbf16, #tpu.memory_space<vmem>>, %arg2: memref<9x32xbf16, #tpu.memory_space<vmem>>, %arg3: memref<1x32xf32, #tpu.memory_space<vmem>>, %arg4: memref<256x32xbf16, #tpu.memory_space<vmem>>) attributes {dimension_semantics = [#tpu.dimension_semantics<parallel>], iteration_bounds = array<i64: 22>, scalar_prefetch = 0 : i64, scratch_operands = 0 : i64, tpu.core_type = #tpu.core_type<tc>, window_params = [{transform_indices = @transform_0, window_bounds = array<i64: 256, 9>}, {pipeline_mode = #tpu.pipeline_mode<synchronous>, transform_indices = @transform_1, window_bounds = array<i64: 9, 32>}, {pipeline_mode = #tpu.pipeline_mode<synchronous>, transform_indices = @transform_2, window_bounds = array<i64: 1, 32>}, {transform_indices = @transform_3, window_bounds = array<i64: 256, 32>}]} {
    %c0 = arith.constant 0 : index
    %c0_0 = arith.constant 0 : index
    %0 = vector.load %arg1[%c0, %c0_0] : memref<256x9xbf16, #tpu.memory_space<vmem>>, vector<256x9xbf16>
    %c0_1 = arith.constant 0 : index
    %c0_2 = arith.constant 0 : index
    %1 = vector.load %arg2[%c0_1, %c0_2] : memref<9x32xbf16, #tpu.memory_space<vmem>>, vector<9x32xbf16>
    %cst = arith.constant dense<0.000000e+00> : vector<256x32xf32>
    %2 = tpu.matmul %0, %1, %cst {dimension_numbers = #tpu.dot_dimension_numbers<[1], [0], [0], [1], [0, 0, 1, 1], [], []>} : vector<256x9xbf16>, vector<9x32xbf16>, vector<256x32xf32> -> vector<256x32xf32>
    %c0_3 = arith.constant 0 : index
    %c0_4 = arith.constant 0 : index
    %3 = vector.load %arg3[%c0_3, %c0_4] : memref<1x32xf32, #tpu.memory_space<vmem>>, vector<1x32xf32>
    %4 = vector.broadcast %3 : vector<1x32xf32> to vector<256x32xf32>
    %5 = arith.addf %2, %4 : vector<256x32xf32>
    %cst_5 = arith.constant 0.000000e+00 : f32
    %6 = vector.broadcast %cst_5 : f32 to vector<256x32xf32>
    %7 = arith.maximumf %5, %6 : vector<256x32xf32>
    %8 = arith.truncf %7 : vector<256x32xf32> to vector<256x32xbf16>
    %c0_6 = arith.constant 0 : index
    %c0_7 = arith.constant 0 : index
    %9 = vector.load %arg4[%c0_6, %c0_7] : memref<256x32xbf16, #tpu.memory_space<vmem>>, vector<256x32xbf16>
    tpu.vector_store %arg4[%c0_6, %c0_7], %8 {strides = array<i32>} : memref<256x32xbf16, #tpu.memory_space<vmem>>, vector<256x32xbf16>,
    return
  }
  func.func @transform_0(%arg0: i32) -> (i32, i32) {
    %c0_i32 = arith.constant 0 : i32
    %c0_i32_0 = arith.constant 0 : i32
    return %arg0, %c0_i32 : i32, i32
  }
  func.func @transform_1(%arg0: i32) -> (i32, i32) {
    %c0_i32 = arith.constant 0 : i32
    %c0_i32_0 = arith.constant 0 : i32
    %c0_i32_1 = arith.constant 0 : i32
    return %c0_i32, %c0_i32_0 : i32, i32
  }
  func.func @transform_2(%arg0: i32) -> (i32, i32) {
    %c0_i32 = arith.constant 0 : i32
    %c0_i32_0 = arith.constant 0 : i32
    %c0_i32_1 = arith.constant 0 : i32
    return %c0_i32, %c0_i32_0 : i32, i32
  }
  func.func @transform_3(%arg0: i32) -> (i32, i32) {
    %c0_i32 = arith.constant 0 : i32
    %c0_i32_0 = arith.constant 0 : i32
    return %arg0, %c0_i32 : i32, i32
  }
}

module attributes {stable_mosaic.version = 11 : i64} {
  func.func @_conv_block_kernel(%arg0: i32, %arg1: memref<256x512xbf16, #tpu.memory_space<vmem>>, %arg2: memref<512x32xbf16, #tpu.memory_space<vmem>>, %arg3: memref<1x32xf32, #tpu.memory_space<vmem>>, %arg4: memref<256x32xbf16, #tpu.memory_space<vmem>>) attributes {dimension_semantics = [#tpu.dimension_semantics<parallel>], iteration_bounds = array<i64: 5>, scalar_prefetch = 0 : i64, scratch_operands = 0 : i64, tpu.core_type = #tpu.core_type<tc>, window_params = [{transform_indices = @transform_0, window_bounds = array<i64: 256, 512>}, {pipeline_mode = #tpu.pipeline_mode<synchronous>, transform_indices = @transform_1, window_bounds = array<i64: 512, 32>}, {pipeline_mode = #tpu.pipeline_mode<synchronous>, transform_indices = @transform_2, window_bounds = array<i64: 1, 32>}, {transform_indices = @transform_3, window_bounds = array<i64: 256, 32>}]} {
    %c0 = arith.constant 0 : index
    %c0_0 = arith.constant 0 : index
    %0 = vector.load %arg1[%c0, %c0_0] : memref<256x512xbf16, #tpu.memory_space<vmem>>, vector<256x512xbf16>
    %c0_1 = arith.constant 0 : index
    %c0_2 = arith.constant 0 : index
    %1 = vector.load %arg2[%c0_1, %c0_2] : memref<512x32xbf16, #tpu.memory_space<vmem>>, vector<512x32xbf16>
    %cst = arith.constant dense<0.000000e+00> : vector<256x32xf32>
    %2 = tpu.matmul %0, %1, %cst {dimension_numbers = #tpu.dot_dimension_numbers<[1], [0], [0], [1], [0, 0, 1, 1], [], []>} : vector<256x512xbf16>, vector<512x32xbf16>, vector<256x32xf32> -> vector<256x32xf32>
    %c0_3 = arith.constant 0 : index
    %c0_4 = arith.constant 0 : index
    %3 = vector.load %arg3[%c0_3, %c0_4] : memref<1x32xf32, #tpu.memory_space<vmem>>, vector<1x32xf32>
    %4 = vector.broadcast %3 : vector<1x32xf32> to vector<256x32xf32>
    %5 = arith.addf %2, %4 : vector<256x32xf32>
    %cst_5 = arith.constant 0.000000e+00 : f32
    %6 = vector.broadcast %cst_5 : f32 to vector<256x32xf32>
    %7 = arith.maximumf %5, %6 : vector<256x32xf32>
    %8 = arith.truncf %7 : vector<256x32xf32> to vector<256x32xbf16>
    %c0_6 = arith.constant 0 : index
    %c0_7 = arith.constant 0 : index
    %9 = vector.load %arg4[%c0_6, %c0_7] : memref<256x32xbf16, #tpu.memory_space<vmem>>, vector<256x32xbf16>
    tpu.vector_store %arg4[%c0_6, %c0_7], %8 {strides = array<i32>} : memref<256x32xbf16, #tpu.memory_space<vmem>>, vector<256x32xbf16>,
    return
  }
  func.func @transform_0(%arg0: i32) -> (i32, i32) {
    %c0_i32 = arith.constant 0 : i32
    %c0_i32_0 = arith.constant 0 : i32
    return %arg0, %c0_i32 : i32, i32
  }
  func.func @transform_1(%arg0: i32) -> (i32, i32) {
    %c0_i32 = arith.constant 0 : i32
    %c0_i32_0 = arith.constant 0 : i32
    %c0_i32_1 = arith.constant 0 : i32
    return %c0_i32, %c0_i32_0 : i32, i32
  }
  func.func @transform_2(%arg0: i32) -> (i32, i32) {
    %c0_i32 = arith.constant 0 : i32
    %c0_i32_0 = arith.constant 0 : i32
    %c0_i32_1 = arith.constant 0 : i32
    return %c0_i32, %c0_i32_0 : i32, i32
  }
  func.func @transform_3(%arg0: i32) -> (i32, i32) {
    %c0_i32 = arith.constant 0 : i32
    %c0_i32_0 = arith.constant 0 : i32
    return %arg0, %c0_i32 : i32, i32
  }
}

module attributes {stable_mosaic.version = 11 : i64} {
  func.func @_conv_block_kernel(%arg0: i32, %arg1: memref<200x512xbf16, #tpu.memory_space<vmem>>, %arg2: memref<512x48xbf16, #tpu.memory_space<vmem>>, %arg3: memref<1x48xf32, #tpu.memory_space<vmem>>, %arg4: memref<200x48xbf16, #tpu.memory_space<vmem>>) attributes {dimension_semantics = [#tpu.dimension_semantics<parallel>], iteration_bounds = array<i64: 1>, scalar_prefetch = 0 : i64, scratch_operands = 0 : i64, tpu.core_type = #tpu.core_type<tc>, window_params = [{transform_indices = @transform_0, window_bounds = array<i64: 200, 512>}, {pipeline_mode = #tpu.pipeline_mode<synchronous>, transform_indices = @transform_1, window_bounds = array<i64: 512, 48>}, {pipeline_mode = #tpu.pipeline_mode<synchronous>, transform_indices = @transform_2, window_bounds = array<i64: 1, 48>}, {transform_indices = @transform_3, window_bounds = array<i64: 200, 48>}]} {
    %c0 = arith.constant 0 : index
    %c0_0 = arith.constant 0 : index
    %0 = vector.load %arg1[%c0, %c0_0] : memref<200x512xbf16, #tpu.memory_space<vmem>>, vector<200x512xbf16>
    %c0_1 = arith.constant 0 : index
    %c0_2 = arith.constant 0 : index
    %1 = vector.load %arg2[%c0_1, %c0_2] : memref<512x48xbf16, #tpu.memory_space<vmem>>, vector<512x48xbf16>
    %cst = arith.constant dense<0.000000e+00> : vector<200x48xf32>
    %2 = tpu.matmul %0, %1, %cst {dimension_numbers = #tpu.dot_dimension_numbers<[1], [0], [0], [1], [0, 0, 1, 1], [], []>} : vector<200x512xbf16>, vector<512x48xbf16>, vector<200x48xf32> -> vector<200x48xf32>
    %c0_3 = arith.constant 0 : index
    %c0_4 = arith.constant 0 : index
    %3 = vector.load %arg3[%c0_3, %c0_4] : memref<1x48xf32, #tpu.memory_space<vmem>>, vector<1x48xf32>
    %4 = vector.broadcast %3 : vector<1x48xf32> to vector<200x48xf32>
    %5 = arith.addf %2, %4 : vector<200x48xf32>
    %cst_5 = arith.constant 0.000000e+00 : f32
    %6 = vector.broadcast %cst_5 : f32 to vector<200x48xf32>
    %7 = arith.maximumf %5, %6 : vector<200x48xf32>
    %8 = arith.truncf %7 : vector<200x48xf32> to vector<200x48xbf16>
    %c0_6 = arith.constant 0 : index
    %c0_7 = arith.constant 0 : index
    %9 = vector.load %arg4[%c0_6, %c0_7] : memref<200x48xbf16, #tpu.memory_space<vmem>>, vector<200x48xbf16>
    tpu.vector_store %arg4[%c0_6, %c0_7], %8 {strides = array<i32>} : memref<200x48xbf16, #tpu.memory_space<vmem>>, vector<200x48xbf16>,
    return
  }
  func.func @transform_0(%arg0: i32) -> (i32, i32) {
    %c0_i32 = arith.constant 0 : i32
    %c0_i32_0 = arith.constant 0 : i32
    return %arg0, %c0_i32 : i32, i32
  }
  func.func @transform_1(%arg0: i32) -> (i32, i32) {
    %c0_i32 = arith.constant 0 : i32
    %c0_i32_0 = arith.constant 0 : i32
    %c0_i32_1 = arith.constant 0 : i32
    return %c0_i32, %c0_i32_0 : i32, i32
  }
  func.func @transform_2(%arg0: i32) -> (i32, i32) {
    %c0_i32 = arith.constant 0 : i32
    %c0_i32_0 = arith.constant 0 : i32
    %c0_i32_1 = arith.constant 0 : i32
    return %c0_i32, %c0_i32_0 : i32, i32
  }
  func.func @transform_3(%arg0: i32) -> (i32, i32) {
    %c0_i32 = arith.constant 0 : i32
    %c0_i32_0 = arith.constant 0 : i32
    return %arg0, %c0_i32 : i32, i32
  }
}

module attributes {stable_mosaic.version = 11 : i64} {
  func.func @_head_kernel(%arg0: i32, %arg1: memref<8x1200xbf16, #tpu.memory_space<vmem>>, %arg2: memref<1200x108xbf16, #tpu.memory_space<vmem>>, %arg3: memref<1x108xf32, #tpu.memory_space<vmem>>, %arg4: memref<108x108xbf16, #tpu.memory_space<vmem>>, %arg5: memref<1x108xf32, #tpu.memory_space<vmem>>, %arg6: memref<108x128xbf16, #tpu.memory_space<vmem>>, %arg7: memref<1x128xf32, #tpu.memory_space<vmem>>, %arg8: memref<8x128xf32, #tpu.memory_space<vmem>>) attributes {dimension_semantics = [#tpu.dimension_semantics<parallel>], iteration_bounds = array<i64: 1>, scalar_prefetch = 0 : i64, scratch_operands = 0 : i64, tpu.core_type = #tpu.core_type<tc>, window_params = [{transform_indices = @transform_0, window_bounds = array<i64: 8, 1200>}, {pipeline_mode = #tpu.pipeline_mode<synchronous>, transform_indices = @transform_1, window_bounds = array<i64: 1200, 108>}, {pipeline_mode = #tpu.pipeline_mode<synchronous>, transform_indices = @transform_2, window_bounds = array<i64: 1, 108>}, {pipeline_mode = #tpu.pipeline_mode<synchronous>, transform_indices = @transform_3, window_bounds = array<i64: 108, 108>}, {pipeline_mode = #tpu.pipeline_mode<synchronous>, transform_indices = @transform_4, window_bounds = array<i64: 1, 108>}, {pipeline_mode = #tpu.pipeline_mode<synchronous>, transform_indices = @transform_5, window_bounds = array<i64: 108, 128>}, {pipeline_mode = #tpu.pipeline_mode<synchronous>, transform_indices = @transform_6, window_bounds = array<i64: 1, 128>}, {transform_indices = @transform_7, window_bounds = array<i64: 8, 128>}]} {
    %c0 = arith.constant 0 : index
    %c0_0 = arith.constant 0 : index
    %0 = vector.load %arg1[%c0, %c0_0] : memref<8x1200xbf16, #tpu.memory_space<vmem>>, vector<8x1200xbf16>
    %c0_1 = arith.constant 0 : index
    %c0_2 = arith.constant 0 : index
    %1 = vector.load %arg2[%c0_1, %c0_2] : memref<1200x108xbf16, #tpu.memory_space<vmem>>, vector<1200x108xbf16>
    %cst = arith.constant dense<0.000000e+00> : vector<8x108xf32>
    %2 = tpu.matmul %0, %1, %cst {dimension_numbers = #tpu.dot_dimension_numbers<[1], [0], [0], [1], [0, 0, 1, 1], [], []>} : vector<8x1200xbf16>, vector<1200x108xbf16>, vector<8x108xf32> -> vector<8x108xf32>
    %c0_3 = arith.constant 0 : index
    %c0_4 = arith.constant 0 : index
    %3 = vector.load %arg3[%c0_3, %c0_4] : memref<1x108xf32, #tpu.memory_space<vmem>>, vector<1x108xf32>
    %4 = vector.broadcast %3 : vector<1x108xf32> to vector<8x108xf32>
    %5 = arith.addf %2, %4 : vector<8x108xf32>
    %cst_5 = arith.constant 3.000000e+00 : f32
    %6 = vector.broadcast %cst_5 : f32 to vector<8x108xf32>
    %7 = arith.addf %5, %6 : vector<8x108xf32>
    %cst_6 = arith.constant 0.000000e+00 : f32
    %cst_7 = arith.constant 6.000000e+00 : f32
    %8 = vector.broadcast %cst_6 : f32 to vector<8x108xf32>
    %9 = arith.maximumf %8, %7 : vector<8x108xf32>
    %10 = vector.broadcast %cst_7 : f32 to vector<8x108xf32>
    %11 = arith.minimumf %10, %9 : vector<8x108xf32>
    %cst_8 = arith.constant 0.166666672 : f32
    %12 = vector.broadcast %cst_8 : f32 to vector<8x108xf32>
    %13 = arith.mulf %11, %12 : vector<8x108xf32>
    %14 = arith.mulf %13, %5 : vector<8x108xf32>
    %15 = arith.truncf %14 : vector<8x108xf32> to vector<8x108xbf16>
    %c0_9 = arith.constant 0 : index
    %c0_10 = arith.constant 0 : index
    %16 = vector.load %arg4[%c0_9, %c0_10] : memref<108x108xbf16, #tpu.memory_space<vmem>>, vector<108x108xbf16>
    %cst_11 = arith.constant dense<0.000000e+00> : vector<8x108xf32>
    %17 = tpu.matmul %15, %16, %cst_11 {dimension_numbers = #tpu.dot_dimension_numbers<[1], [0], [0], [1], [0, 0, 1, 1], [], []>} : vector<8x108xbf16>, vector<108x108xbf16>, vector<8x108xf32> -> vector<8x108xf32>
    %c0_12 = arith.constant 0 : index
    %c0_13 = arith.constant 0 : index
    %18 = vector.load %arg5[%c0_12, %c0_13] : memref<1x108xf32, #tpu.memory_space<vmem>>, vector<1x108xf32>
    %19 = vector.broadcast %18 : vector<1x108xf32> to vector<8x108xf32>
    %20 = arith.addf %17, %19 : vector<8x108xf32>
    %cst_14 = arith.constant 3.000000e+00 : f32
    %21 = vector.broadcast %cst_14 : f32 to vector<8x108xf32>
    %22 = arith.addf %20, %21 : vector<8x108xf32>
    %cst_15 = arith.constant 0.000000e+00 : f32
    %cst_16 = arith.constant 6.000000e+00 : f32
    %23 = vector.broadcast %cst_15 : f32 to vector<8x108xf32>
    %24 = arith.maximumf %23, %22 : vector<8x108xf32>
    %25 = vector.broadcast %cst_16 : f32 to vector<8x108xf32>
    %26 = arith.minimumf %25, %24 : vector<8x108xf32>
    %cst_17 = arith.constant 0.166666672 : f32
    %27 = vector.broadcast %cst_17 : f32 to vector<8x108xf32>
    %28 = arith.mulf %26, %27 : vector<8x108xf32>
    %29 = arith.mulf %28, %20 : vector<8x108xf32>
    %30 = arith.truncf %29 : vector<8x108xf32> to vector<8x108xbf16>
    %c0_18 = arith.constant 0 : index
    %c0_19 = arith.constant 0 : index
    %31 = vector.load %arg6[%c0_18, %c0_19] : memref<108x128xbf16, #tpu.memory_space<vmem>>, vector<108x128xbf16>
    %cst_20 = arith.constant dense<0.000000e+00> : vector<8x128xf32>
    %32 = tpu.matmul %30, %31, %cst_20 {dimension_numbers = #tpu.dot_dimension_numbers<[1], [0], [0], [1], [0, 0, 1, 1], [], []>} : vector<8x108xbf16>, vector<108x128xbf16>, vector<8x128xf32> -> vector<8x128xf32>
    %c0_21 = arith.constant 0 : index
    %c0_22 = arith.constant 0 : index
    %33 = vector.load %arg7[%c0_21, %c0_22] : memref<1x128xf32, #tpu.memory_space<vmem>>, vector<1x128xf32>
    %34 = vector.broadcast %33 : vector<1x128xf32> to vector<8x128xf32>
    %35 = arith.addf %32, %34 : vector<8x128xf32>
    %cst_23 = arith.constant dense<0xFF800000> : vector<8xf32>
    %36 = vector.multi_reduction <maximumf>, %35, %cst_23 [1] : vector<8x128xf32> to vector<8xf32>
    %37 = vector.shape_cast %36 : vector<8xf32> to vector<8x1xf32>
    %38 = vector.broadcast %37 : vector<8x1xf32> to vector<8x128xf32>
    %39 = arith.subf %35, %38 : vector<8x128xf32>
    %40 = math.exp %39 : vector<8x128xf32>
    %cst_24 = arith.constant dense<0.000000e+00> : vector<8xf32>
    %41 = vector.multi_reduction <add>, %40, %cst_24 [1] : vector<8x128xf32> to vector<8xf32>
    %42 = vector.shape_cast %41 : vector<8xf32> to vector<8x1xf32>
    %43 = math.log %42 : vector<8x1xf32>
    %44 = arith.addf %43, %37 : vector<8x1xf32>
    %45 = vector.broadcast %44 : vector<8x1xf32> to vector<8x128xf32>
    %46 = arith.subf %35, %45 : vector<8x128xf32>
    %c0_25 = arith.constant 0 : index
    %c0_26 = arith.constant 0 : index
    %47 = vector.load %arg8[%c0_25, %c0_26] : memref<8x128xf32, #tpu.memory_space<vmem>>, vector<8x128xf32>
    tpu.vector_store %arg8[%c0_25, %c0_26], %46 {strides = array<i32>} : memref<8x128xf32, #tpu.memory_space<vmem>>, vector<8x128xf32>,
    return
  }
  func.func @transform_0(%arg0: i32) -> (i32, i32) {
    %c0_i32 = arith.constant 0 : i32
    %c0_i32_0 = arith.constant 0 : i32
    return %arg0, %c0_i32 : i32, i32
  }
  func.func @transform_1(%arg0: i32) -> (i32, i32) {
    %c0_i32 = arith.constant 0 : i32
    %c0_i32_0 = arith.constant 0 : i32
    %c0_i32_1 = arith.constant 0 : i32
    return %c0_i32, %c0_i32_0 : i32, i32
  }
  func.func @transform_2(%arg0: i32) -> (i32, i32) {
    %c0_i32 = arith.constant 0 : i32
    %c0_i32_0 = arith.constant 0 : i32
    %c0_i32_1 = arith.constant 0 : i32
    return %c0_i32, %c0_i32_0 : i32, i32
  }
  func.func @transform_3(%arg0: i32) -> (i32, i32) {
    %c0_i32 = arith.constant 0 : i32
    %c0_i32_0 = arith.constant 0 : i32
    %c0_i32_1 = arith.constant 0 : i32
    return %c0_i32, %c0_i32_0 : i32, i32
  }
  func.func @transform_4(%arg0: i32) -> (i32, i32) {
    %c0_i32 = arith.constant 0 : i32
    %c0_i32_0 = arith.constant 0 : i32
    %c0_i32_1 = arith.constant 0 : i32
    return %c0_i32, %c0_i32_0 : i32, i32
  }
  func.func @transform_5(%arg0: i32) -> (i32, i32) {
    %c0_i32 = arith.constant 0 : i32
    %c0_i32_0 = arith.constant 0 : i32
    %c0_i32_1 = arith.constant 0 : i32
    return %c0_i32, %c0_i32_0 : i32, i32
  }
  func.func @transform_6(%arg0: i32) -> (i32, i32) {
    %c0_i32 = arith.constant 0 : i32
    %c0_i32_0 = arith.constant 0 : i32
    %c0_i32_1 = arith.constant 0 : i32
    return %c0_i32, %c0_i32_0 : i32, i32
  }
  func.func @transform_7(%arg0: i32) -> (i32, i32) {
    %c0_i32 = arith.constant 0 : i32
    %c0_i32_0 = arith.constant 0 : i32
    return %arg0, %c0_i32 : i32, i32
  }
}

</mosaic_0001>

<bundles_post_ra>
// kernel: conv2dnet_forward.4
= control target key start
LH: loop header
LB: loop body
LE: loop exit
PB: predicated region body
PF: predicated region fallthrough
CT: control target
= control target key end

     0   :  { %s984_s12 = smov 0   ;;  %s1148_s0 = inlined_call_operand.vmem [shape: bf16[5632,9], index: 0, kind: input, shape index: {}]   ;;  %s1149_s1 = inlined_call_operand.vmem [shape: bf16[9,32], index: 1, kind: input, shape index: {}]   ;;  %s1150_s2 = inlined_call_operand.vmem [shape: f32[1,32], index: 2, kind: input, shape index: {}]   ;;  %s1151_s3 = inlined_call_operand.vmem [shape: bf16[5632,32], index: 3, kind: output, shape index: {}]  }
   0x1 LB: > { %s767_s13 = sadd.s32 4294967295, %s961_s12   ;;  %p771_p0 = scmp.ge.s32.totalorder %s961_s12, 1  ;;  %s961_s12 = sphi %s984_s12, %s13_s12  }
   0x2   : > { %p138_p1 = scmp.lt.s32.totalorder %s961_s12, 23 }
   0x4   : > { %p139_p2 = pnand %p771_p0, %p138_p1 }
   0x5   : > { %v938_v0 = vld [vmem:[%s1149_s1] sm:$0x1f] (!%p139_p2)   ;;  %vm350_vm0 = vcmask (!%p139_p2), 1043456   ;;  %vm351_vm1 = vcmask (!%p139_p2), 1044480   ;;  %s772_s16 = sshll.u32 (!%p139_p2), %s767_s13, 5  ;;  %v963_v1 = vmov (!%p139_p2), 65535  }
   0x6   : > { %142 = sbr.rel (%p139_p2) target bundleno = 265 (0x109), region = 32  ;;  %v352_v2 = vsel (!%p139_p2), %vm350_vm0, 4294967295, %v963_v1  ;;  %p163_p3 = scmp.lt.s32.totalorder (!%p139_p2), %s772_s16, 703  ;;  %vm301_vm2 = vcmask (!%p139_p2), 72704   ;;  %v1040_v21 = vld [vmem:[%s1150_s2] ss:$0 sm:$0xff] (!%p139_p2) }
   0x7   : > { %v353_v3 = vsel (!%p139_p2), %vm351_vm1, %v352_v2, 0  ;;  %vm678_vm3 = vcmask (!%p139_p2), 257024  }
   0x8   : > { %v355_v4 = vand.u32 (!%p139_p2), %v938_v0, %v353_v3 }
   0xa   : > { %893 = vmatprep.subr.bf16.mxu0 (!%p139_p2), %v355_v4  ;;  %927 = vmatprep.subr.bf16.mxu1 (!%p139_p2), %v355_v4 }
   0xb   : > { %894 = vmatpush3.bf16.msra.mxu0 (!%p139_p2), %v355_v4  ;;  %928 = vmatpush3.bf16.msra.mxu1 (!%p139_p2), %v355_v4 }
   0xd   : > { %s1153_s16 = smov (!%p163_p3, %s772_s16), 703 }
   0xe   : > { %s773_s17 = sshll.u32 %s1153_s16, 2 }
   0xf   : > { %s1003_s20 = scalar_lea.vmem %s1148_s0, %s773_s17  ;;  %s1052_s25 = scalar_lea.vmem %s1151_s3, %s773_s17 }
  0x10   : > { %v939_v5 = vld [vmem:[%s1003_s20] sm:$0xff]   ;;  %v941_v7 = vld [vmem:[%s1003_s20 + $0x8] sm:$0xff]   ;;  %v943_v9 = vld [vmem:[%s1003_s20 + $0x10] sm:$0xff]  }
  0x11   : > { %v940_v6 = vld [vmem:[%s1003_s20 + $0x40] sm:$0xff]   ;;  %895 = vmatprep.mubr.msk.bf16.mxu0 %vm301_vm2, %v939_v5  ;;  %v942_v8 = vld [vmem:[%s1003_s20 + $0x48] sm:$0xff]   ;;  %v944_v10 = vld [vmem:[%s1003_s20 + $0x50] sm:$0xff]  }
  0x12   : > { %911 = vmatprep.mubr.msk.bf16.mxu1 %vm301_vm2, %v940_v6  ;;  %896 = vmatmul.mubr.msk.bf16.vlgmr.msra.gmra.mrb[0].mxu0 %vm301_vm2, %v941_v7  ;;  %v945_v11 = vld [vmem:[%s1003_s20 + $0x18] sm:$0xff]   ;;  %v947_v13 = vld [vmem:[%s1003_s20 + $0x20] sm:$0xff]   ;;  %v949_v15 = vld [vmem:[%s1003_s20 + $0x28] sm:$0xff]  }
  0x13   : > { %912 = vmatmul.mubr.msk.bf16.vlgmr.msra.gmra.mrb[0].mxu1 %vm301_vm2, %v942_v8  ;;  %899 = vmatprep.mubr.msk.bf16.mxu0 %vm301_vm2, %v943_v9  ;;  %v946_v12 = vld [vmem:[%s1003_s20 + $0x58] sm:$0xff]   ;;  %v948_v14 = vld [vmem:[%s1003_s20 + $0x60] sm:$0xff]   ;;  %v950_v16 = vld [vmem:[%s1003_s20 + $0x68] sm:$0xff]  }
  0x14   : > { %915 = vmatprep.mubr.msk.bf16.mxu1 %vm301_vm2, %v944_v10  ;;  %v951_v17 = vld [vmem:[%s1003_s20 + $0x30] sm:$0xff]   ;;  %v953_v19 = vld [vmem:[%s1003_s20 + $0x38] sm:$0xff]  }
  0x15   : > { %v952_v18 = vld [vmem:[%s1003_s20 + $0x70] sm:$0xff]   ;;  %v954_v20 = vld [vmem:[%s1003_s20 + $0x78] sm:$0xff]  }
  0x1a   : > { %900 = vmatmul.mubr.msk.bf16.gmra.mrb[4].mxu0 %vm301_vm2, %v945_v11 }
  0x1b   : > { %916 = vmatmul.mubr.msk.bf16.gmra.mrb[4].mxu1 %vm301_vm2, %v946_v12  ;;  %903 = vmatprep.mubr.msk.bf16.mxu0 %vm301_vm2, %v947_v13 }
  0x1c   : > { %919 = vmatprep.mubr.msk.bf16.mxu1 %vm301_vm2, %v948_v14 }
  0x22   : > { %904 = vmatmul.mubr.msk.bf16.gmra.mrb[8].mxu0 %vm301_vm2, %v949_v15 }
  0x23   : > { %920 = vmatmul.mubr.msk.bf16.gmra.mrb[8].mxu1 %vm301_vm2, %v950_v16  ;;  %907 = vmatprep.mubr.msk.bf16.mxu0 %vm301_vm2, %v951_v17 }
  0x24   : > { %923 = vmatprep.mubr.msk.bf16.mxu1 %vm301_vm2, %v952_v18 }
  0x2a   : > { %908 = vmatmul.mubr.msk.bf16.gmra.mrb[12].mxu0 %vm301_vm2, %v953_v19 }
  0x2b   : > { %924 = vmatmul.mubr.msk.bf16.gmra.mrb[12].mxu1 %vm301_vm2, %v954_v20 }
  0xe5   : > { %v897_v22 = vpop.f32.mrb[0].mxu0 }
  0xe6   : > { %v400_v23 = vadd.f32 %v897_v22, %v1040_v21  ;;  %v913_v24 = vpop.f32.mrb[0].mxu1  ;;  %v391_v25 = vpop.f32.mrb[1].mxu0 }
  0xe7   : > { %v464_v26 = vadd.f32 %v913_v24, %v1040_v21  ;;  %v392_v27 = vadd.f32 %v1040_v21, %v391_v25  ;;  %v455_v28 = vpop.f32.mrb[1].mxu1  ;;  %v898_v29 = vpop.f32.mrb[2].mxu0 }
  0xe8   : > { %v520_v30 = vmax.f32 %v400_v23, 0.0  ;;  %v456_v31 = vadd.f32 %v1040_v21, %v455_v28  ;;  %v403_v32 = vadd.f32 %v898_v29, %v1040_v21  ;;  %v914_v33 = vpop.f32.mrb[2].mxu1  ;;  %v394_v34 = vpop.f32.mrb[3].mxu0 }
  0xe9   : > { %v536_v35 = vmax.f32 %v464_v26, 0.0  ;;  %v518_v36 = vmax.f32 %v392_v27, 0.0  ;;  %v467_v37 = vadd.f32 %v914_v33, %v1040_v21  ;;  %v395_v38 = vadd.f32 %v1040_v21, %v394_v34  ;;  %v458_v39 = vpop.f32.mrb[3].mxu1 }
  0xea   : > { %v846_v40 = vpack.c.bf16 %v520_v30, %v520_v30  ;;  %v534_v41 = vmax.f32 %v456_v31, 0.0  ;;  %v521_v42 = vmax.f32 %v403_v32, 0.0  ;;  %v459_v43 = vadd.f32 %v1040_v21, %v458_v39 }
  0xeb   : > { %v862_v44 = vpack.c.bf16 %v536_v35, %v536_v35  ;;  %v844_v45 = vpack.c.bf16 %v518_v36, %v518_v36  ;;  %v537_v46 = vmax.f32 %v467_v37, 0.0  ;;  %v519_v47 = vmax.f32 %v395_v38, 0.0 }
  0xec   : > { %681 = vst.msk [vmem:[%s1052_s25 + $0x8] sm:$0xf] %vm678_vm3, %v846_v40  ;;  %v860_v48 = vpack.c.bf16 %v534_v41, %v534_v41  ;;  %v847_v49 = vpack.c.bf16 %v521_v42, %v521_v42  ;;  %v535_v50 = vmax.f32 %v459_v43, 0.0 }
  0xed   : > { %697 = vst.msk [vmem:[%s1052_s25 + $0x48] sm:$0xf] %vm678_vm3, %v862_v44  ;;  %679 = vst.msk [vmem:[%s1052_s25] sm:$0xf] %vm678_vm3, %v844_v45  ;;  %v863_v51 = vpack.c.bf16 %v537_v46, %v537_v46  ;;  %v845_v52 = vpack.c.bf16 %v519_v47, %v519_v47  ;;  %v901_v53 = vpop.f32.mrb[4].mxu0 }
  0xee   : > { %695 = vst.msk [vmem:[%s1052_s25 + $0x40] sm:$0xf] %vm678_vm3, %v860_v48  ;;  %682 = vst.msk [vmem:[%s1052_s25 + $0xc] sm:$0xf] %vm678_vm3, %v847_v49  ;;  %v861_v54 = vpack.c.bf16 %v535_v50, %v535_v50  ;;  %v416_v55 = vadd.f32 %v901_v53, %v1040_v21  ;;  %v917_v56 = vpop.f32.mrb[4].mxu1  ;;  %v407_v57 = vpop.f32.mrb[5].mxu0 }
  0xef   : > { %698 = vst.msk [vmem:[%s1052_s25 + $0x4c] sm:$0xf] %vm678_vm3, %v863_v51  ;;  %680 = vst.msk [vmem:[%s1052_s25 + $0x4] sm:$0xf] %vm678_vm3, %v845_v52  ;;  %v480_v58 = vadd.f32 %v917_v56, %v1040_v21  ;;  %v408_v59 = vadd.f32 %v1040_v21, %v407_v57  ;;  %v471_v60 = vpop.f32.mrb[5].mxu1  ;;  %v902_v61 = vpop.f32.mrb[6].mxu0 }
  0xf0   : > { %696 = vst.msk [vmem:[%s1052_s25 + $0x44] sm:$0xf] %vm678_vm3, %v861_v54  ;;  %v524_v62 = vmax.f32 %v416_v55, 0.0  ;;  %v472_v63 = vadd.f32 %v1040_v21, %v471_v60  ;;  %v419_v0 = vadd.f32 %v902_v61, %v1040_v21  ;;  %v918_v1 = vpop.f32.mrb[6].mxu1  ;;  %v410_v2 = vpop.f32.mrb[7].mxu0 }
  0xf1   : > { %v540_v3 = vmax.f32 %v480_v58, 0.0  ;;  %v522_v4 = vmax.f32 %v408_v59, 0.0  ;;  %v483_v5 = vadd.f32 %v918_v1, %v1040_v21  ;;  %v411_v6 = vadd.f32 %v1040_v21, %v410_v2  ;;  %v474_v7 = vpop.f32.mrb[7].mxu1 }
  0xf2   : > { %v850_v8 = vpack.c.bf16 %v524_v62, %v524_v62  ;;  %v538_v9 = vmax.f32 %v472_v63, 0.0  ;;  %v525_v10 = vmax.f32 %v419_v0, 0.0  ;;  %v475_v11 = vadd.f32 %v1040_v21, %v474_v7 }
  0xf3   : > { %v866_v12 = vpack.c.bf16 %v540_v3, %v540_v3  ;;  %v848_v13 = vpack.c.bf16 %v522_v4, %v522_v4  ;;  %v541_v14 = vmax.f32 %v483_v5, 0.0  ;;  %v523_v15 = vmax.f32 %v411_v6, 0.0 }
  0xf4   : > { %685 = vst.msk [vmem:[%s1052_s25 + $0x18] sm:$0xf] %vm678_vm3, %v850_v8  ;;  %v864_v16 = vpack.c.bf16 %v538_v9, %v538_v9  ;;  %v851_v17 = vpack.c.bf16 %v525_v10, %v525_v10  ;;  %v539_v18 = vmax.f32 %v475_v11, 0.0 }
  0xf5   : > { %701 = vst.msk [vmem:[%s1052_s25 + $0x58] sm:$0xf] %vm678_vm3, %v866_v12  ;;  %683 = vst.msk [vmem:[%s1052_s25 + $0x10] sm:$0xf] %vm678_vm3, %v848_v13  ;;  %v867_v19 = vpack.c.bf16 %v541_v14, %v541_v14  ;;  %v849_v20 = vpack.c.bf16 %v523_v15, %v523_v15  ;;  %v905_v22 = vpop.f32.mrb[8].mxu0 }
  0xf6   : > { %699 = vst.msk [vmem:[%s1052_s25 + $0x50] sm:$0xf] %vm678_vm3, %v864_v16  ;;  %686 = vst.msk [vmem:[%s1052_s25 + $0x1c] sm:$0xf] %vm678_vm3, %v851_v17  ;;  %v865_v23 = vpack.c.bf16 %v539_v18, %v539_v18  ;;  %v432_v24 = vadd.f32 %v905_v22, %v1040_v21  ;;  %v921_v25 = vpop.f32.mrb[8].mxu1  ;;  %v423_v26 = vpop.f32.mrb[9].mxu0 }
  0xf7   : > { %702 = vst.msk [vmem:[%s1052_s25 + $0x5c] sm:$0xf] %vm678_vm3, %v867_v19  ;;  %684 = vst.msk [vmem:[%s1052_s25 + $0x14] sm:$0xf] %vm678_vm3, %v849_v20  ;;  %v496_v27 = vadd.f32 %v921_v25, %v1040_v21  ;;  %v424_v28 = vadd.f32 %v1040_v21, %v423_v26  ;;  %v487_v29 = vpop.f32.mrb[9].mxu1  ;;  %v906_v30 = vpop.f32.mrb[10].mxu0 }
  0xf8   : > { %700 = vst.msk [vmem:[%s1052_s25 + $0x54] sm:$0xf] %vm678_vm3, %v865_v23  ;;  %v528_v31 = vmax.f32 %v432_v24, 0.0  ;;  %v488_v32 = vadd.f32 %v1040_v21, %v487_v29  ;;  %v435_v33 = vadd.f32 %v906_v30, %v1040_v21  ;;  %v922_v34 = vpop.f32.mrb[10].mxu1  ;;  %v426_v35 = vpop.f32.mrb[11].mxu0 }
  0xf9   : > { %v544_v36 = vmax.f32 %v496_v27, 0.0  ;;  %v526_v37 = vmax.f32 %v424_v28, 0.0  ;;  %v499_v38 = vadd.f32 %v922_v34, %v1040_v21  ;;  %v427_v39 = vadd.f32 %v1040_v21, %v426_v35  ;;  %v490_v40 = vpop.f32.mrb[11].mxu1 }
  0xfa   : > { %v854_v41 = vpack.c.bf16 %v528_v31, %v528_v31  ;;  %v542_v42 = vmax.f32 %v488_v32, 0.0  ;;  %v529_v43 = vmax.f32 %v435_v33, 0.0  ;;  %v491_v44 = vadd.f32 %v1040_v21, %v490_v40 }
  0xfb   : > { %v870_v45 = vpack.c.bf16 %v544_v36, %v544_v36  ;;  %v852_v46 = vpack.c.bf16 %v526_v37, %v526_v37  ;;  %v545_v47 = vmax.f32 %v499_v38, 0.0  ;;  %v527_v48 = vmax.f32 %v427_v39, 0.0 }
  0xfc   : > { %689 = vst.msk [vmem:[%s1052_s25 + $0x28] sm:$0xf] %vm678_vm3, %v854_v41  ;;  %v868_v49 = vpack.c.bf16 %v542_v42, %v542_v42  ;;  %v855_v50 = vpack.c.bf16 %v529_v43, %v529_v43  ;;  %v543_v51 = vmax.f32 %v491_v44, 0.0 }
  0xfd   : > { %705 = vst.msk [vmem:[%s1052_s25 + $0x68] sm:$0xf] %vm678_vm3, %v870_v45  ;;  %687 = vst.msk [vmem:[%s1052_s25 + $0x20] sm:$0xf] %vm678_vm3, %v852_v46  ;;  %v871_v52 = vpack.c.bf16 %v545_v47, %v545_v47  ;;  %v853_v53 = vpack.c.bf16 %v527_v48, %v527_v48  ;;  %v909_v54 = vpop.f32.mrb[12].mxu0 }
  0xfe   : > { %703 = vst.msk [vmem:[%s1052_s25 + $0x60] sm:$0xf] %vm678_vm3, %v868_v49  ;;  %690 = vst.msk [vmem:[%s1052_s25 + $0x2c] sm:$0xf] %vm678_vm3, %v855_v50  ;;  %v869_v55 = vpack.c.bf16 %v543_v51, %v543_v51  ;;  %v448_v56 = vadd.f32 %v909_v54, %v1040_v21  ;;  %v925_v57 = vpop.f32.mrb[12].mxu1  ;;  %v439_v58 = vpop.f32.mrb[13].mxu0 }
  0xff   : > { %706 = vst.msk [vmem:[%s1052_s25 + $0x6c] sm:$0xf] %vm678_vm3, %v871_v52  ;;  %688 = vst.msk [vmem:[%s1052_s25 + $0x24] sm:$0xf] %vm678_vm3, %v853_v53  ;;  %v512_v59 = vadd.f32 %v925_v57, %v1040_v21  ;;  %v440_v60 = vadd.f32 %v1040_v21, %v439_v58  ;;  %v503_v61 = vpop.f32.mrb[13].mxu1  ;;  %v910_v62 = vpop.f32.mrb[14].mxu0 }
 0x100   : > { %704 = vst.msk [vmem:[%s1052_s25 + $0x64] sm:$0xf] %vm678_vm3, %v869_v55  ;;  %v532_v63 = vmax.f32 %v448_v56, 0.0  ;;  %v504_v0 = vadd.f32 %v1040_v21, %v503_v61  ;;  %v451_v1 = vadd.f32 %v910_v62, %v1040_v21  ;;  %v926_v2 = vpop.f32.mrb[14].mxu1  ;;  %v442_v3 = vpop.f32.mrb[15].mxu0 }
 0x101   : > { %v548_v4 = vmax.f32 %v512_v59, 0.0  ;;  %v530_v5 = vmax.f32 %v440_v60, 0.0  ;;  %v515_v6 = vadd.f32 %v926_v2, %v1040_v21  ;;  %v443_v7 = vadd.f32 %v1040_v21, %v442_v3  ;;  %v506_v8 = vpop.f32.mrb[15].mxu1 }
 0x102   : > { %v858_v9 = vpack.c.bf16 %v532_v63, %v532_v63  ;;  %v546_v10 = vmax.f32 %v504_v0, 0.0  ;;  %v533_v11 = vmax.f32 %v451_v1, 0.0  ;;  %v507_v12 = vadd.f32 %v1040_v21, %v506_v8 }
 0x103   : > { %v874_v13 = vpack.c.bf16 %v548_v4, %v548_v4  ;;  %v856_v14 = vpack.c.bf16 %v530_v5, %v530_v5  ;;  %v549_v15 = vmax.f32 %v515_v6, 0.0  ;;  %v531_v16 = vmax.f32 %v443_v7, 0.0 }
 0x104   : > { %693 = vst.msk [vmem:[%s1052_s25 + $0x38] sm:$0xf] %vm678_vm3, %v858_v9  ;;  %v872_v17 = vpack.c.bf16 %v546_v10, %v546_v10  ;;  %v859_v18 = vpack.c.bf16 %v533_v11, %v533_v11  ;;  %v547_v19 = vmax.f32 %v507_v12, 0.0 }
 0x105   : > { %709 = vst.msk [vmem:[%s1052_s25 + $0x78] sm:$0xf] %vm678_vm3, %v874_v13  ;;  %691 = vst.msk [vmem:[%s1052_s25 + $0x30] sm:$0xf] %vm678_vm3, %v856_v14  ;;  %v875_v20 = vpack.c.bf16 %v549_v15, %v549_v15  ;;  %v857_v22 = vpack.c.bf16 %v531_v16, %v531_v16 }
 0x106   : > { %707 = vst.msk [vmem:[%s1052_s25 + $0x70] sm:$0xf] %vm678_vm3, %v872_v17  ;;  %694 = vst.msk [vmem:[%s1052_s25 + $0x3c] sm:$0xf] %vm678_vm3, %v859_v18  ;;  %v873_v21 = vpack.c.bf16 %v547_v19, %v547_v19 }
 0x107   : > { %710 = vst.msk [vmem:[%s1052_s25 + $0x7c] sm:$0xf] %vm678_vm3, %v875_v20  ;;  %692 = vst.msk [vmem:[%s1052_s25 + $0x34] sm:$0xf] %vm678_vm3, %v857_v22 }
 0x108   : > { %708 = vst.msk [vmem:[%s1052_s25 + $0x74] sm:$0xf] %vm678_vm3, %v873_v21 }
 0x109 PF: > { %s13_s12 = sadd.s32 1, %s961_s12  }
 0x10a   : > { %p10_p4 = scmp.ge.s32.totalorder %s13_s12, 24  }
 0x10c   :  { %12 = sbr.rel (!%p10_p4) target bundleno = 1 (0x1), region = 62 }

// kernel: conv2dnet_forward.5
= control target key start
LH: loop header
LB: loop body
LE: loop exit
PB: predicated region body
PF: predicated region fallthrough
CT: control target
= control target key end

     0   :  { %s1958_s12 = smov 0   ;;  %s2246_s0 = inlined_call_operand.vmem [shape: bf16[1280,512], index: 0, kind: input, shape index: {}]   ;;  %s2247_s1 = inlined_call_operand.vmem [shape: bf16[512,32], index: 1, kind: input, shape index: {}]   ;;  %s2248_s2 = inlined_call_operand.vmem [shape: f32[1,32], index: 2, kind: input, shape index: {}]   ;;  %s2249_s3 = inlined_call_operand.vmem [shape: bf16[1280,32], index: 3, kind: output, shape index: {}]  }
   0x1 LB: > { %s1396_s13 = sadd.s32 4294967295, %s1936_s12   ;;  %p1400_p0 = scmp.ge.s32.totalorder %s1936_s12, 1  ;;  %s1936_s12 = sphi %s1958_s12, %s13_s12  }
   0x2   : > { %p139_p1 = scmp.lt.s32.totalorder %s1936_s12, 6 }
   0x4   : > { %p140_p2 = pnand %p1400_p0, %p139_p1 }
   0x5   : > { %v1802_v0 = vld [vmem:[%s2247_s1 + $0x40] sm:$0xff] (!%p140_p2)   ;;  %v1806_v4 = vld [vmem:[%s2247_s1 + $0x48] sm:$0xff] (!%p140_p2)   ;;  %v1810_v8 = vld [vmem:[%s2247_s1 + $0x50] sm:$0xff] (!%p140_p2)   ;;  %s1401_s21 = sshll.u32 (!%p140_p2), %s1396_s13, 5  ;;  %vm1307_vm0 = vcmask (!%p140_p2), 257024  }
   0x6   : > { %143 = sbr.rel (%p140_p2) target bundleno = 385 (0x181), region = 32  ;;  %v1803_v1 = vld [vmem:[%s2247_s1 + $0xc0] sm:$0xff] (!%p140_p2)   ;;  %1570 = vmatprep.subr.bf16.mxu0 (!%p140_p2), %v1802_v0  ;;  %v1807_v5 = vld [vmem:[%s2247_s1 + $0xc8] sm:$0xff] (!%p140_p2)   ;;  %v1811_v9 = vld [vmem:[%s2247_s1 + $0xd0] sm:$0xff] (!%p140_p2)   ;;  %p165_p3 = scmp.lt.s32.totalorder (!%p140_p2), %s1401_s21, 159 }
   0x7   : > { %v1804_v2 = vld [vmem:[%s2247_s1] sm:$0xff] (!%p140_p2)   ;;  %1682 = vmatprep.subr.bf16.mxu1 (!%p140_p2), %v1803_v1  ;;  %v1808_v6 = vld [vmem:[%s2247_s1 + $0x8] sm:$0xff] (!%p140_p2)   ;;  %v1812_v10 = vld [vmem:[%s2247_s1 + $0x10] sm:$0xff] (!%p140_p2)  }
   0x8   : > { %v1805_v3 = vld [vmem:[%s2247_s1 + $0x80] sm:$0xff] (!%p140_p2)   ;;  %1571 = vmatpush3.bf16.msra.mxu0 (!%p140_p2), %v1804_v2  ;;  %v1809_v7 = vld [vmem:[%s2247_s1 + $0x88] sm:$0xff] (!%p140_p2)   ;;  %v1813_v11 = vld [vmem:[%s2247_s1 + $0x90] sm:$0xff] (!%p140_p2)  }
   0x9   : > { %1683 = vmatpush3.bf16.msra.mxu1 (!%p140_p2), %v1805_v3  ;;  %1572 = vmatprep.subr.bf16.mxu0 (!%p140_p2), %v1806_v4  ;;  %v1814_v12 = vld [vmem:[%s2247_s1 + $0x58] sm:$0xff] (!%p140_p2)   ;;  %v1818_v16 = vld [vmem:[%s2247_s1 + $0x60] sm:$0xff] (!%p140_p2)   ;;  %v1822_v20 = vld [vmem:[%s2247_s1 + $0x68] sm:$0xff] (!%p140_p2)  }
   0xa   : > { %1684 = vmatprep.subr.bf16.mxu1 (!%p140_p2), %v1807_v5  ;;  %v1815_v13 = vld [vmem:[%s2247_s1 + $0xd8] sm:$0xff] (!%p140_p2)   ;;  %v1819_v17 = vld [vmem:[%s2247_s1 + $0xe0] sm:$0xff] (!%p140_p2)   ;;  %v1823_v21 = vld [vmem:[%s2247_s1 + $0xe8] sm:$0xff] (!%p140_p2)  }
   0xb   : > { %v1816_v14 = vld [vmem:[%s2247_s1 + $0x18] sm:$0xff] (!%p140_p2)   ;;  %v1820_v18 = vld [vmem:[%s2247_s1 + $0x20] sm:$0xff] (!%p140_p2)   ;;  %v1824_v22 = vld [vmem:[%s2247_s1 + $0x28] sm:$0xff] (!%p140_p2)  }
   0xc   : > { %1573 = vmatpush3.bf16.msra.mxu0 (!%p140_p2), %v1808_v6  ;;  %v1817_v15 = vld [vmem:[%s2247_s1 + $0x98] sm:$0xff] (!%p140_p2)   ;;  %v1821_v19 = vld [vmem:[%s2247_s1 + $0xa0] sm:$0xff] (!%p140_p2)   ;;  %v1825_v23 = vld [vmem:[%s2247_s1 + $0xa8] sm:$0xff] (!%p140_p2)  }
   0xd   : > { %1685 = vmatpush3.bf16.msra.mxu1 %v1809_v7  ;;  %1574 = vmatprep.subr.bf16.mxu0 %v1810_v8  ;;  %s2251_s21 = smov (!%p165_p3, %s1401_s21), 159  ;;  %v1826_v24 = vld [vmem:[%s2247_s1 + $0x70] sm:$0xff]   ;;  %v1830_v28 = vld [vmem:[%s2247_s1 + $0x78] sm:$0xff]  }
   0xe   : > { %1686 = vmatprep.subr.bf16.mxu1 %v1811_v9  ;;  %v1827_v25 = vld [vmem:[%s2247_s1 + $0xf0] sm:$0xff]   ;;  %s1537_s18 = sshll.u32 %s2251_s21, 4  ;;  %v1831_v29 = vld [vmem:[%s2247_s1 + $0xf8] sm:$0xff]   ;;  %s1405_s7 = sshll.u32 %s2251_s21, 2 }
   0xf   : > { %v1828_v26 = vld [vmem:[%s2247_s1 + $0x30] sm:$0xff]   ;;  %s2064_s28 = scalar_lea.vmem %s2246_s0, %s1537_s18  ;;  %v1832_v30 = vld [vmem:[%s2247_s1 + $0x38] sm:$0xff]   ;;  %s2147_s10 = scalar_lea.vmem %s2249_s3, %s1405_s7 }
  0x10   : > { %1575 = vmatpush3.bf16.msra.mxu0 %v1812_v10  ;;  %v1829_v27 = vld [vmem:[%s2247_s1 + $0xb0] sm:$0xff]   ;;  %v1833_v31 = vld [vmem:[%s2247_s1 + $0xb8] sm:$0xff]  }
  0x11   : > { %1687 = vmatpush3.bf16.msra.mxu1 %v1813_v11  ;;  %1576 = vmatprep.subr.bf16.mxu0 %v1814_v12  ;;  %v1834_v32 = vld [vmem:[%s2064_s28] ss:$16 sps:$4 sm:$0xff]   ;;  %v1836_v33 = vld [vmem:[%s2064_s28 + $0x4] ss:$16 sps:$4 sm:$0xff]   ;;  %v1837_v34 = vld [vmem:[%s2064_s28 + $0x8] ss:$16 sps:$4 sm:$0xff]  }
  0x12   : > { %1688 = vmatprep.subr.bf16.mxu1 %v1815_v13  ;;  %v1839_v35 = vld [vmem:[%s2064_s28 + $0xc] ss:$16 sps:$4 sm:$0xff]   ;;  %857 = vmatprep.mubr.bf16.mxu0 %v1836_v33  ;;  %v1840_v36 = vld [vmem:[%s2064_s28 + $0x24] ss:$16 sps:$4 sm:$0xff]   ;;  %v1844_v38 = vld [vmem:[%s2064_s28 + $0x20] ss:$16 sps:$4 sm:$0xff]  }
  0x13   : > { %1018 = vmatprep.mubr.bf16.mxu1 %v1839_v35  ;;  %v1842_v37 = vld [vmem:[%s2064_s28 + $0x2c] ss:$16 sps:$4 sm:$0xff]   ;;  %v1845_v39 = vld [vmem:[%s2064_s28 + $0x28] ss:$16 sps:$4 sm:$0xff]   ;;  %v1846_v40 = vld [vmem:[%s2064_s28 + $0x44] ss:$16 sps:$4 sm:$0xff]  }
  0x14   : > { %1577 = vmatpush3.bf16.msra.mxu0 %v1816_v14  ;;  %v1848_v41 = vld [vmem:[%s2064_s28 + $0x4c] ss:$16 sps:$4 sm:$0xff]   ;;  %v1850_v42 = vld [vmem:[%s2064_s28 + $0x40] ss:$16 sps:$4 sm:$0xff]   ;;  %v1851_v43 = vld [vmem:[%s2064_s28 + $0x48] ss:$16 sps:$4 sm:$0xff]  }
  0x15   : > { %1689 = vmatpush3.bf16.msra.mxu1 %v1817_v15  ;;  %1578 = vmatprep.subr.bf16.mxu0 %v1818_v16  ;;  %v1852_v44 = vld [vmem:[%s2064_s28 + $0x64] ss:$16 sps:$4 sm:$0xff]   ;;  %v1854_v45 = vld [vmem:[%s2064_s28 + $0x6c] ss:$16 sps:$4 sm:$0xff]   ;;  %v1856_v46 = vld [vmem:[%s2064_s28 + $0x60] ss:$16 sps:$4 sm:$0xff]  }
  0x16   : > { %1690 = vmatprep.subr.bf16.mxu1 %v1819_v17  ;;  %v1857_v47 = vld [vmem:[%s2064_s28 + $0x68] ss:$16 sps:$4 sm:$0xff]   ;;  %v1858_v48 = vld [vmem:[%s2064_s28 + $0x84] ss:$16 sps:$4 sm:$0xff]   ;;  %v1860_v49 = vld [vmem:[%s2064_s28 + $0x8c] ss:$16 sps:$4 sm:$0xff]  }
  0x17   : > { %v1862_v50 = vld [vmem:[%s2064_s28 + $0x80] ss:$16 sps:$4 sm:$0xff]   ;;  %v1863_v51 = vld [vmem:[%s2064_s28 + $0x88] ss:$16 sps:$4 sm:$0xff]   ;;  %v1864_v52 = vld [vmem:[%s2064_s28 + $0xa4] ss:$16 sps:$4 sm:$0xff]  }
  0x18   : > { %1579 = vmatpush3.bf16.msra.mxu0 %v1820_v18  ;;  %v1866_v53 = vld [vmem:[%s2064_s28 + $0xac] ss:$16 sps:$4 sm:$0xff]   ;;  %v1868_v54 = vld [vmem:[%s2064_s28 + $0xa0] ss:$16 sps:$4 sm:$0xff]   ;;  %v1869_v55 = vld [vmem:[%s2064_s28 + $0xa8] ss:$16 sps:$4 sm:$0xff]  }
  0x19   : > { %1691 = vmatpush3.bf16.msra.mxu1 %v1821_v19  ;;  %1580 = vmatprep.subr.bf16.mxu0 %v1822_v20  ;;  %v1870_v56 = vld [vmem:[%s2064_s28 + $0xc4] ss:$16 sps:$4 sm:$0xff]   ;;  %v1872_v57 = vld [vmem:[%s2064_s28 + $0xcc] ss:$16 sps:$4 sm:$0xff]   ;;  %v1874_v58 = vld [vmem:[%s2064_s28 + $0xc0] ss:$16 sps:$4 sm:$0xff]  }
  0x1a   : > { %1692 = vmatprep.subr.bf16.mxu1 %v1823_v21  ;;  %v1875_v59 = vld [vmem:[%s2064_s28 + $0xc8] ss:$16 sps:$4 sm:$0xff]   ;;  %v1876_v60 = vld [vmem:[%s2064_s28 + $0xe4] ss:$16 sps:$4 sm:$0xff]   ;;  %v1878_v61 = vld [vmem:[%s2064_s28 + $0xec] ss:$16 sps:$4 sm:$0xff]  }
  0x1b   : > { %v1880_v62 = vld [vmem:[%s2064_s28 + $0xe0] ss:$16 sps:$4 sm:$0xff]   ;;  %v1881_v63 = vld [vmem:[%s2064_s28 + $0xe8] ss:$16 sps:$4 sm:$0xff]   ;;  %v1882_v0 = vld [vmem:[%s2064_s28 + $0x104] ss:$16 sps:$4 sm:$0xff]  }
  0x1c   : > { %1581 = vmatpush3.bf16.msra.mxu0 %v1824_v22  ;;  %v1884_v1 = vld [vmem:[%s2064_s28 + $0x10c] ss:$16 sps:$4 sm:$0xff]   ;;  %v1886_v2 = vld [vmem:[%s2064_s28 + $0x100] ss:$16 sps:$4 sm:$0xff]   ;;  %v1887_v3 = vld [vmem:[%s2064_s28 + $0x108] ss:$16 sps:$4 sm:$0xff]  }
  0x1d   : > { %1693 = vmatpush3.bf16.msra.mxu1 %v1825_v23  ;;  %1582 = vmatprep.subr.bf16.mxu0 %v1826_v24  ;;  %v1888_v4 = vld [vmem:[%s2064_s28 + $0x124] ss:$16 sps:$4 sm:$0xff]   ;;  %v1890_v5 = vld [vmem:[%s2064_s28 + $0x12c] ss:$16 sps:$4 sm:$0xff]   ;;  %v1892_v6 = vld [vmem:[%s2064_s28 + $0x120] ss:$16 sps:$4 sm:$0xff]  }
  0x1e   : > { %1694 = vmatprep.subr.bf16.mxu1 %v1827_v25  ;;  %v1893_v7 = vld [vmem:[%s2064_s28 + $0x128] ss:$16 sps:$4 sm:$0xff]   ;;  %v1894_v8 = vld [vmem:[%s2064_s28 + $0x144] ss:$16 sps:$4 sm:$0xff]   ;;  %v1896_v9 = vld [vmem:[%s2064_s28 + $0x14c] ss:$16 sps:$4 sm:$0xff]  }
  0x1f   : > { %v1898_v10 = vld [vmem:[%s2064_s28 + $0x140] ss:$16 sps:$4 sm:$0xff]   ;;  %v1899_v11 = vld [vmem:[%s2064_s28 + $0x148] ss:$16 sps:$4 sm:$0xff]   ;;  %v1900_v12 = vld [vmem:[%s2064_s28 + $0x164] ss:$16 sps:$4 sm:$0xff]  }
  0x20   : > { %1583 = vmatpush3.bf16.msra.mxu0 %v1828_v26  ;;  %v1902_v13 = vld [vmem:[%s2064_s28 + $0x16c] ss:$16 sps:$4 sm:$0xff]   ;;  %v1904_v14 = vld [vmem:[%s2064_s28 + $0x160] ss:$16 sps:$4 sm:$0xff]   ;;  %v1905_v15 = vld [vmem:[%s2064_s28 + $0x168] ss:$16 sps:$4 sm:$0xff]  }
  0x21   : > { %1695 = vmatpush3.bf16.msra.mxu1 %v1829_v27  ;;  %1584 = vmatprep.subr.bf16.mxu0 %v1830_v28  ;;  %v1906_v16 = vld [vmem:[%s2064_s28 + $0x184] ss:$16 sps:$4 sm:$0xff]   ;;  %v1908_v17 = vld [vmem:[%s2064_s28 + $0x18c] ss:$16 sps:$4 sm:$0xff]   ;;  %v1910_v18 = vld [vmem:[%s2064_s28 + $0x180] ss:$16 sps:$4 sm:$0xff]  }
  0x22   : > { %1696 = vmatprep.subr.bf16.mxu1 %v1831_v29  ;;  %v1911_v19 = vld [vmem:[%s2064_s28 + $0x188] ss:$16 sps:$4 sm:$0xff]   ;;  %v1912_v20 = vld [vmem:[%s2064_s28 + $0x1a4] ss:$16 sps:$4 sm:$0xff]   ;;  %v1914_v21 = vld [vmem:[%s2064_s28 + $0x1ac] ss:$16 sps:$4 sm:$0xff]  }
  0x23   : > { %v1916_v22 = vld [vmem:[%s2064_s28 + $0x1a0] ss:$16 sps:$4 sm:$0xff]   ;;  %v1917_v23 = vld [vmem:[%s2064_s28 + $0x1a8] ss:$16 sps:$4 sm:$0xff]   ;;  %v1918_v24 = vld [vmem:[%s2064_s28 + $0x1c4] ss:$16 sps:$4 sm:$0xff]  }
  0x24   : > { %1585 = vmatpush3.bf16.msra.mxu0 %v1832_v30  ;;  %v1920_v25 = vld [vmem:[%s2064_s28 + $0x1cc] ss:$16 sps:$4 sm:$0xff]   ;;  %v1922_v26 = vld [vmem:[%s2064_s28 + $0x1c0] ss:$16 sps:$4 sm:$0xff]   ;;  %v1923_v27 = vld [vmem:[%s2064_s28 + $0x1c8] ss:$16 sps:$4 sm:$0xff]  }
  0x25   : > { %1697 = vmatpush3.bf16.msra.mxu1 %v1833_v31  ;;  %v1924_v28 = vld [vmem:[%s2064_s28 + $0x1e4] ss:$16 sps:$4 sm:$0xff]   ;;  %v1926_v29 = vld [vmem:[%s2064_s28 + $0x1ec] ss:$16 sps:$4 sm:$0xff]   ;;  %v1928_v30 = vld [vmem:[%s2064_s28 + $0x1e0] ss:$16 sps:$4 sm:$0xff]  }
  0x26   : > { %v1929_v31 = vld [vmem:[%s2064_s28 + $0x1e8] ss:$16 sps:$4 sm:$0xff]  }
  0x27   : > { %858 = vmatmul.mubr.bf16.vlgmr.msra.gmra.mrb[0].mxu0 %v1834_v32 }
  0x28   : > { %1019 = vmatmul.mubr.bf16.vlgmr.msra.gmra.mrb[0].mxu1 %v1837_v34  ;;  %865 = vmatprep.mubr.bf16.mxu0 %v1840_v36  ;;  %v2139_v34 = vld [vmem:[%s2248_s2] ss:$0 sm:$0xff] }
  0x29   : > { %1026 = vmatprep.mubr.bf16.mxu1 %v1842_v37 }
  0x2f   : > { %866 = vmatmul.mubr.bf16.gmra.mrb[4].mxu0 %v1844_v38 }
  0x30   : > { %1027 = vmatmul.mubr.bf16.gmra.mrb[4].mxu1 %v1845_v39  ;;  %873 = vmatprep.mubr.bf16.mxu0 %v1846_v40 }
  0x31   : > { %1034 = vmatprep.mubr.bf16.mxu1 %v1848_v41 }
  0x37   : > { %874 = vmatmul.mubr.bf16.gmra.mrb[8].mxu0 %v1850_v42 }
  0x38   : > { %1035 = vmatmul.mubr.bf16.gmra.mrb[8].mxu1 %v1851_v43  ;;  %881 = vmatprep.mubr.bf16.mxu0 %v1852_v44 }
  0x39   : > { %1042 = vmatprep.mubr.bf16.mxu1 %v1854_v45 }
  0x3f   : > { %882 = vmatmul.mubr.bf16.gmra.mrb[12].mxu0 %v1856_v46 }
  0x40   : > { %1043 = vmatmul.mubr.bf16.gmra.mrb[12].mxu1 %v1857_v47  ;;  %889 = vmatprep.mubr.bf16.mxu0 %v1858_v48 }
  0x41   : > { %1050 = vmatprep.mubr.bf16.mxu1 %v1860_v49 }
  0x47   : > { %890 = vmatmul.mubr.bf16.gmra.mrb[16].mxu0 %v1862_v50 }
  0x48   : > { %1051 = vmatmul.mubr.bf16.gmra.mrb[16].mxu1 %v1863_v51  ;;  %897 = vmatprep.mubr.bf16.mxu0 %v1864_v52 }
  0x49   : > { %1058 = vmatprep.mubr.bf16.mxu1 %v1866_v53 }
  0x4f   : > { %898 = vmatmul.mubr.bf16.gmra.mrb[20].mxu0 %v1868_v54 }
  0x50   : > { %1059 = vmatmul.mubr.bf16.gmra.mrb[20].mxu1 %v1869_v55  ;;  %905 = vmatprep.mubr.bf16.mxu0 %v1870_v56 }
  0x51   : > { %1066 = vmatprep.mubr.bf16.mxu1 %v1872_v57 }
  0x57   : > { %906 = vmatmul.mubr.bf16.gmra.mrb[24].mxu0 %v1874_v58 }
  0x58   : > { %1067 = vmatmul.mubr.bf16.gmra.mrb[24].mxu1 %v1875_v59  ;;  %913 = vmatprep.mubr.bf16.mxu0 %v1876_v60 }
  0x59   : > { %1074 = vmatprep.mubr.bf16.mxu1 %v1878_v61 }
  0x5f   : > { %914 = vmatmul.mubr.bf16.gmra.mrb[28].mxu0 %v1880_v62 }
  0x60   : > { %1075 = vmatmul.mubr.bf16.gmra.mrb[28].mxu1 %v1881_v63  ;;  %921 = vmatprep.mubr.bf16.mxu0 %v1882_v0 }
  0x61   : > { %1082 = vmatprep.mubr.bf16.mxu1 %v1884_v1 }
  0x67   : > { %922 = vmatmul.mubr.bf16.gmra.mrb[32].mxu0 %v1886_v2 }
  0x68   : > { %1083 = vmatmul.mubr.bf16.gmra.mrb[32].mxu1 %v1887_v3  ;;  %929 = vmatprep.mubr.bf16.mxu0 %v1888_v4 }
  0x69   : > { %1090 = vmatprep.mubr.bf16.mxu1 %v1890_v5 }
  0x6f   : > { %930 = vmatmul.mubr.bf16.gmra.mrb[36].mxu0 %v1892_v6 }
  0x70   : > { %1091 = vmatmul.mubr.bf16.gmra.mrb[36].mxu1 %v1893_v7  ;;  %937 = vmatprep.mubr.bf16.mxu0 %v1894_v8 }
  0x71   : > { %1098 = vmatprep.mubr.bf16.mxu1 %v1896_v9 }
  0x77   : > { %938 = vmatmul.mubr.bf16.gmra.mrb[40].mxu0 %v1898_v10 }
  0x78   : > { %1099 = vmatmul.mubr.bf16.gmra.mrb[40].mxu1 %v1899_v11  ;;  %945 = vmatprep.mubr.bf16.mxu0 %v1900_v12 }
  0x79   : > { %1106 = vmatprep.mubr.bf16.mxu1 %v1902_v13 }
  0x7f   : > { %946 = vmatmul.mubr.bf16.gmra.mrb[44].mxu0 %v1904_v14 }
  0x80   : > { %1107 = vmatmul.mubr.bf16.gmra.mrb[44].mxu1 %v1905_v15  ;;  %953 = vmatprep.mubr.bf16.mxu0 %v1906_v16 }
  0x81   : > { %1114 = vmatprep.mubr.bf16.mxu1 %v1908_v17 }
  0x87   : > { %954 = vmatmul.mubr.bf16.gmra.mrb[48].mxu0 %v1910_v18 }
  0x88   : > { %1115 = vmatmul.mubr.bf16.gmra.mrb[48].mxu1 %v1911_v19  ;;  %961 = vmatprep.mubr.bf16.mxu0 %v1912_v20 }
  0x89   : > { %1122 = vmatprep.mubr.bf16.mxu1 %v1914_v21 }
  0x8f   : > { %962 = vmatmul.mubr.bf16.gmra.mrb[52].mxu0 %v1916_v22 }
  0x90   : > { %1123 = vmatmul.mubr.bf16.gmra.mrb[52].mxu1 %v1917_v23  ;;  %969 = vmatprep.mubr.bf16.mxu0 %v1918_v24 }
  0x91   : > { %1130 = vmatprep.mubr.bf16.mxu1 %v1920_v25 }
  0x97   : > { %970 = vmatmul.mubr.bf16.gmra.mrb[56].mxu0 %v1922_v26 }
  0x98   : > { %1131 = vmatmul.mubr.bf16.gmra.mrb[56].mxu1 %v1923_v27  ;;  %977 = vmatprep.mubr.bf16.mxu0 %v1924_v28 }
  0x99   : > { %1138 = vmatprep.mubr.bf16.mxu1 %v1926_v29 }
  0x9f   : > { %978 = vmatmul.mubr.bf16.gmra.mrb[60].mxu0 %v1928_v30 }
  0xa0   : > { %1139 = vmatmul.mubr.bf16.gmra.mrb[60].mxu1 %v1929_v31 }
  0xfa   : > { %v1586_v32 = vpop.f32.mrb[0].mxu0 }
  0xfb   : > { %v1698_v33 = vpop.f32.mrb[0].mxu1  ;;  %v1587_v35 = vpop.f32.mrb[1].mxu0 }
  0xfc   : > { %v1588_v36 = vadd.f32 %v1587_v35, %v1586_v32  ;;  %v1699_v37 = vpop.f32.mrb[1].mxu1  ;;  %v1589_v38 = vpop.f32.mrb[2].mxu0 }
  0xfd   : > { %v1700_v39 = vadd.f32 %v1699_v37, %v1698_v33  ;;  %v1701_v40 = vpop.f32.mrb[2].mxu1  ;;  %v1590_v41 = vpop.f32.mrb[3].mxu0 }
  0xfe   : > { %v860_v42 = vadd.f32 %v1588_v36, %v2139_v34  ;;  %v1591_v43 = vadd.f32 %v1590_v41, %v1589_v38  ;;  %v1702_v44 = vpop.f32.mrb[3].mxu1 }
  0xff   : > { %v1703_v45 = vadd.f32 %v1702_v44, %v1701_v40 }
 0x100   : > { %v1021_v46 = vadd.f32 %v1700_v39, %v860_v42  ;;  %v863_v47 = vadd.f32 %v1591_v43, %v2139_v34 }
 0x102   : > { %v1147_v48 = vmax.f32 %v1021_v46, 0.0  ;;  %v1024_v49 = vadd.f32 %v1703_v45, %v863_v47  ;;  %v1592_v50 = vpop.f32.mrb[4].mxu0 }
 0x103   : > { %v1704_v51 = vpop.f32.mrb[4].mxu1  ;;  %v1593_v52 = vpop.f32.mrb[5].mxu0 }
 0x104   : > { %v1538_v53 = vpack.c.bf16 %v1147_v48, %v1147_v48  ;;  %v1148_v54 = vmax.f32 %v1024_v49, 0.0  ;;  %v1594_v55 = vadd.f32 %v1593_v52, %v1592_v50  ;;  %v1705_v56 = vpop.f32.mrb[5].mxu1  ;;  %v1595_v57 = vpop.f32.mrb[6].mxu0 }
 0x105   : > { %v1706_v58 = vadd.f32 %v1705_v56, %v1704_v51  ;;  %v1707_v59 = vpop.f32.mrb[6].mxu1  ;;  %v1596_v60 = vpop.f32.mrb[7].mxu0 }
 0x106   : > { %1308 = vst.msk [vmem:[%s2147_s10] sm:$0xf] %vm1307_vm0, %v1538_v53  ;;  %v1539_v61 = vpack.c.bf16 %v1148_v54, %v1148_v54  ;;  %v868_v62 = vadd.f32 %v1594_v55, %v2139_v34  ;;  %v1597_v63 = vadd.f32 %v1596_v60, %v1595_v57  ;;  %v1708_v0 = vpop.f32.mrb[7].mxu1 }
 0x107   : > { %v1709_v1 = vadd.f32 %v1708_v0, %v1707_v59 }
 0x108   : > { %1309 = vst.msk [vmem:[%s2147_s10 + $0x4] sm:$0xf] %vm1307_vm0, %v1539_v61  ;;  %v1029_v2 = vadd.f32 %v1706_v58, %v868_v62  ;;  %v871_v3 = vadd.f32 %v1597_v63, %v2139_v34 }
 0x10a   : > { %v1149_v4 = vmax.f32 %v1029_v2, 0.0  ;;  %v1032_v5 = vadd.f32 %v1709_v1, %v871_v3  ;;  %v1598_v6 = vpop.f32.mrb[8].mxu0 }
 0x10b   : > { %v1710_v7 = vpop.f32.mrb[8].mxu1  ;;  %v1599_v8 = vpop.f32.mrb[9].mxu0 }
 0x10c   : > { %v1540_v9 = vpack.c.bf16 %v1149_v4, %v1149_v4  ;;  %v1150_v10 = vmax.f32 %v1032_v5, 0.0  ;;  %v1600_v11 = vadd.f32 %v1599_v8, %v1598_v6  ;;  %v1711_v12 = vpop.f32.mrb[9].mxu1  ;;  %v1601_v13 = vpop.f32.mrb[10].mxu0 }
 0x10d   : > { %v1712_v14 = vadd.f32 %v1711_v12, %v1710_v7  ;;  %v1713_v15 = vpop.f32.mrb[10].mxu1  ;;  %v1602_v16 = vpop.f32.mrb[11].mxu0 }
 0x10e   : > { %1310 = vst.msk [vmem:[%s2147_s10 + $0x8] sm:$0xf] %vm1307_vm0, %v1540_v9  ;;  %v1541_v17 = vpack.c.bf16 %v1150_v10, %v1150_v10  ;;  %v876_v18 = vadd.f32 %v1600_v11, %v2139_v34  ;;  %v1603_v19 = vadd.f32 %v1602_v16, %v1601_v13  ;;  %v1714_v20 = vpop.f32.mrb[11].mxu1 }
 0x10f   : > { %v1715_v21 = vadd.f32 %v1714_v20, %v1713_v15 }
 0x110   : > { %1311 = vst.msk [vmem:[%s2147_s10 + $0xc] sm:$0xf] %vm1307_vm0, %v1541_v17  ;;  %v1037_v22 = vadd.f32 %v1712_v14, %v876_v18  ;;  %v879_v23 = vadd.f32 %v1603_v19, %v2139_v34 }
 0x112   : > { %v1151_v24 = vmax.f32 %v1037_v22, 0.0  ;;  %v1040_v25 = vadd.f32 %v1715_v21, %v879_v23  ;;  %v1604_v26 = vpop.f32.mrb[12].mxu0 }
 0x113   : > { %v1716_v27 = vpop.f32.mrb[12].mxu1  ;;  %v1605_v28 = vpop.f32.mrb[13].mxu0 }
 0x114   : > { %v1542_v29 = vpack.c.bf16 %v1151_v24, %v1151_v24  ;;  %v1152_v30 = vmax.f32 %v1040_v25, 0.0  ;;  %v1606_v31 = vadd.f32 %v1605_v28, %v1604_v26  ;;  %v1717_v32 = vpop.f32.mrb[13].mxu1  ;;  %v1607_v33 = vpop.f32.mrb[14].mxu0 }
 0x115   : > { %v1718_v35 = vadd.f32 %v1717_v32, %v1716_v27  ;;  %v1719_v36 = vpop.f32.mrb[14].mxu1  ;;  %v1608_v37 = vpop.f32.mrb[15].mxu0 }
 0x116   : > { %1312 = vst.msk [vmem:[%s2147_s10 + $0x10] sm:$0xf] %vm1307_vm0, %v1542_v29  ;;  %v1543_v38 = vpack.c.bf16 %v1152_v30, %v1152_v30  ;;  %v884_v39 = vadd.f32 %v1606_v31, %v2139_v34  ;;  %v1609_v40 = vadd.f32 %v1608_v37, %v1607_v33  ;;  %v1720_v41 = vpop.f32.mrb[15].mxu1 }
 0x117   : > { %v1721_v42 = vadd.f32 %v1720_v41, %v1719_v36 }
 0x118   : > { %1313 = vst.msk [vmem:[%s2147_s10 + $0x14] sm:$0xf] %vm1307_vm0, %v1543_v38  ;;  %v1045_v43 = vadd.f32 %v1718_v35, %v884_v39  ;;  %v887_v44 = vadd.f32 %v1609_v40, %v2139_v34 }
 0x11a   : > { %v1153_v45 = vmax.f32 %v1045_v43, 0.0  ;;  %v1048_v46 = vadd.f32 %v1721_v42, %v887_v44  ;;  %v1610_v47 = vpop.f32.mrb[16].mxu0 }
 0x11b   : > { %v1722_v48 = vpop.f32.mrb[16].mxu1  ;;  %v1611_v49 = vpop.f32.mrb[17].mxu0 }
 0x11c   : > { %v1544_v50 = vpack.c.bf16 %v1153_v45, %v1153_v45  ;;  %v1154_v51 = vmax.f32 %v1048_v46, 0.0  ;;  %v1612_v52 = vadd.f32 %v1611_v49, %v1610_v47  ;;  %v1723_v53 = vpop.f32.mrb[17].mxu1  ;;  %v1613_v54 = vpop.f32.mrb[18].mxu0 }
 0x11d   : > { %v1724_v55 = vadd.f32 %v1723_v53, %v1722_v48  ;;  %v1725_v56 = vpop.f32.mrb[18].mxu1  ;;  %v1614_v57 = vpop.f32.mrb[19].mxu0 }
 0x11e   : > { %1314 = vst.msk [vmem:[%s2147_s10 + $0x18] sm:$0xf] %vm1307_vm0, %v1544_v50  ;;  %v1545_v58 = vpack.c.bf16 %v1154_v51, %v1154_v51  ;;  %v892_v59 = vadd.f32 %v1612_v52, %v2139_v34  ;;  %v1615_v60 = vadd.f32 %v1614_v57, %v1613_v54  ;;  %v1726_v61 = vpop.f32.mrb[19].mxu1 }
 0x11f   : > { %v1727_v62 = vadd.f32 %v1726_v61, %v1725_v56 }
 0x120   : > { %1315 = vst.msk [vmem:[%s2147_s10 + $0x1c] sm:$0xf] %vm1307_vm0, %v1545_v58  ;;  %v1053_v63 = vadd.f32 %v1724_v55, %v892_v59  ;;  %v895_v0 = vadd.f32 %v1615_v60, %v2139_v34 }
 0x122   : > { %v1155_v1 = vmax.f32 %v1053_v63, 0.0  ;;  %v1056_v2 = vadd.f32 %v1727_v62, %v895_v0  ;;  %v1616_v3 = vpop.f32.mrb[20].mxu0 }
 0x123   : > { %v1728_v4 = vpop.f32.mrb[20].mxu1  ;;  %v1617_v5 = vpop.f32.mrb[21].mxu0 }
 0x124   : > { %v1546_v6 = vpack.c.bf16 %v1155_v1, %v1155_v1  ;;  %v1156_v7 = vmax.f32 %v1056_v2, 0.0  ;;  %v1618_v8 = vadd.f32 %v1617_v5, %v1616_v3  ;;  %v1729_v9 = vpop.f32.mrb[21].mxu1  ;;  %v1619_v10 = vpop.f32.mrb[22].mxu0 }
 0x125   : > { %v1730_v11 = vadd.f32 %v1729_v9, %v1728_v4  ;;  %v1731_v12 = vpop.f32.mrb[22].mxu1  ;;  %v1620_v13 = vpop.f32.mrb[23].mxu0 }
 0x126   : > { %1316 = vst.msk [vmem:[%s2147_s10 + $0x20] sm:$0xf] %vm1307_vm0, %v1546_v6  ;;  %v1547_v14 = vpack.c.bf16 %v1156_v7, %v1156_v7  ;;  %v900_v15 = vadd.f32 %v1618_v8, %v2139_v34  ;;  %v1621_v16 = vadd.f32 %v1620_v13, %v1619_v10  ;;  %v1732_v17 = vpop.f32.mrb[23].mxu1 }
 0x127   : > { %v1733_v18 = vadd.f32 %v1732_v17, %v1731_v12 }
 0x128   : > { %1317 = vst.msk [vmem:[%s2147_s10 + $0x24] sm:$0xf] %vm1307_vm0, %v1547_v14  ;;  %v1061_v19 = vadd.f32 %v1730_v11, %v900_v15  ;;  %v903_v20 = vadd.f32 %v1621_v16, %v2139_v34 }
 0x12a   : > { %v1157_v21 = vmax.f32 %v1061_v19, 0.0  ;;  %v1064_v22 = vadd.f32 %v1733_v18, %v903_v20  ;;  %v1622_v23 = vpop.f32.mrb[24].mxu0 }
 0x12b   : > { %v1734_v24 = vpop.f32.mrb[24].mxu1  ;;  %v1623_v25 = vpop.f32.mrb[25].mxu0 }
 0x12c   : > { %v1548_v26 = vpack.c.bf16 %v1157_v21, %v1157_v21  ;;  %v1158_v27 = vmax.f32 %v1064_v22, 0.0  ;;  %v1624_v28 = vadd.f32 %v1623_v25, %v1622_v23  ;;  %v1735_v29 = vpop.f32.mrb[25].mxu1  ;;  %v1625_v30 = vpop.f32.mrb[26].mxu0 }
 0x12d   : > { %v1736_v31 = vadd.f32 %v1735_v29, %v1734_v24  ;;  %v1737_v32 = vpop.f32.mrb[26].mxu1  ;;  %v1626_v33 = vpop.f32.mrb[27].mxu0 }
 0x12e   : > { %1318 = vst.msk [vmem:[%s2147_s10 + $0x28] sm:$0xf] %vm1307_vm0, %v1548_v26  ;;  %v1549_v35 = vpack.c.bf16 %v1158_v27, %v1158_v27  ;;  %v908_v36 = vadd.f32 %v1624_v28, %v2139_v34  ;;  %v1627_v37 = vadd.f32 %v1626_v33, %v1625_v30  ;;  %v1738_v38 = vpop.f32.mrb[27].mxu1 }
 0x12f   : > { %v1739_v39 = vadd.f32 %v1738_v38, %v1737_v32 }
 0x130   : > { %1319 = vst.msk [vmem:[%s2147_s10 + $0x2c] sm:$0xf] %vm1307_vm0, %v1549_v35  ;;  %v1069_v40 = vadd.f32 %v1736_v31, %v908_v36  ;;  %v911_v41 = vadd.f32 %v1627_v37, %v2139_v34 }
 0x132   : > { %v1159_v42 = vmax.f32 %v1069_v40, 0.0  ;;  %v1072_v43 = vadd.f32 %v1739_v39, %v911_v41  ;;  %v1628_v44 = vpop.f32.mrb[28].mxu0 }
 0x133   : > { %v1740_v45 = vpop.f32.mrb[28].mxu1  ;;  %v1629_v46 = vpop.f32.mrb[29].mxu0 }
 0x134   : > { %v1550_v47 = vpack.c.bf16 %v1159_v42, %v1159_v42  ;;  %v1160_v48 = vmax.f32 %v1072_v43, 0.0  ;;  %v1630_v49 = vadd.f32 %v1629_v46, %v1628_v44  ;;  %v1741_v50 = vpop.f32.mrb[29].mxu1  ;;  %v1631_v51 = vpop.f32.mrb[30].mxu0 }
 0x135   : > { %v1742_v52 = vadd.f32 %v1741_v50, %v1740_v45  ;;  %v1743_v53 = vpop.f32.mrb[30].mxu1  ;;  %v1632_v54 = vpop.f32.mrb[31].mxu0 }
 0x136   : > { %1320 = vst.msk [vmem:[%s2147_s10 + $0x30] sm:$0xf] %vm1307_vm0, %v1550_v47  ;;  %v1551_v55 = vpack.c.bf16 %v1160_v48, %v1160_v48  ;;  %v916_v56 = vadd.f32 %v1630_v49, %v2139_v34  ;;  %v1633_v57 = vadd.f32 %v1632_v54, %v1631_v51  ;;  %v1744_v58 = vpop.f32.mrb[31].mxu1 }
 0x137   : > { %v1745_v59 = vadd.f32 %v1744_v58, %v1743_v53 }
 0x138   : > { %1321 = vst.msk [vmem:[%s2147_s10 + $0x34] sm:$0xf] %vm1307_vm0, %v1551_v55  ;;  %v1077_v60 = vadd.f32 %v1742_v52, %v916_v56  ;;  %v919_v61 = vadd.f32 %v1633_v57, %v2139_v34 }
 0x13a   : > { %v1161_v62 = vmax.f32 %v1077_v60, 0.0  ;;  %v1080_v63 = vadd.f32 %v1745_v59, %v919_v61  ;;  %v1634_v0 = vpop.f32.mrb[32].mxu0 }
 0x13b   : > { %v1746_v1 = vpop.f32.mrb[32].mxu1  ;;  %v1635_v2 = vpop.f32.mrb[33].mxu0 }
 0x13c   : > { %v1552_v3 = vpack.c.bf16 %v1161_v62, %v1161_v62  ;;  %v1162_v4 = vmax.f32 %v1080_v63, 0.0  ;;  %v1636_v5 = vadd.f32 %v1635_v2, %v1634_v0  ;;  %v1747_v6 = vpop.f32.mrb[33].mxu1  ;;  %v1637_v7 = vpop.f32.mrb[34].mxu0 }
 0x13d   : > { %v1748_v8 = vadd.f32 %v1747_v6, %v1746_v1  ;;  %v1749_v9 = vpop.f32.mrb[34].mxu1  ;;  %v1638_v10 = vpop.f32.mrb[35].mxu0 }
 0x13e   : > { %1322 = vst.msk [vmem:[%s2147_s10 + $0x38] sm:$0xf] %vm1307_vm0, %v1552_v3  ;;  %v1553_v11 = vpack.c.bf16 %v1162_v4, %v1162_v4  ;;  %v924_v12 = vadd.f32 %v1636_v5, %v2139_v34  ;;  %v1639_v13 = vadd.f32 %v1638_v10, %v1637_v7  ;;  %v1750_v14 = vpop.f32.mrb[35].mxu1 }
 0x13f   : > { %v1751_v15 = vadd.f32 %v1750_v14, %v1749_v9 }
 0x140   : > { %1323 = vst.msk [vmem:[%s2147_s10 + $0x3c] sm:$0xf] %vm1307_vm0, %v1553_v11  ;;  %v1085_v16 = vadd.f32 %v1748_v8, %v924_v12  ;;  %v927_v17 = vadd.f32 %v1639_v13, %v2139_v34 }
 0x142   : > { %v1163_v18 = vmax.f32 %v1085_v16, 0.0  ;;  %v1088_v19 = vadd.f32 %v1751_v15, %v927_v17  ;;  %v1640_v20 = vpop.f32.mrb[36].mxu0 }
 0x143   : > { %v1752_v21 = vpop.f32.mrb[36].mxu1  ;;  %v1641_v22 = vpop.f32.mrb[37].mxu0 }
 0x144   : > { %v1554_v23 = vpack.c.bf16 %v1163_v18, %v1163_v18  ;;  %v1164_v24 = vmax.f32 %v1088_v19, 0.0  ;;  %v1642_v25 = vadd.f32 %v1641_v22, %v1640_v20  ;;  %v1753_v26 = vpop.f32.mrb[37].mxu1  ;;  %v1643_v27 = vpop.f32.mrb[38].mxu0 }
 0x145   : > { %v1754_v28 = vadd.f32 %v1753_v26, %v1752_v21  ;;  %v1755_v29 = vpop.f32.mrb[38].mxu1  ;;  %v1644_v30 = vpop.f32.mrb[39].mxu0 }
 0x146   : > { %1324 = vst.msk [vmem:[%s2147_s10 + $0x40] sm:$0xf] %vm1307_vm0, %v1554_v23  ;;  %v1555_v31 = vpack.c.bf16 %v1164_v24, %v1164_v24  ;;  %v932_v32 = vadd.f32 %v1642_v25, %v2139_v34  ;;  %v1645_v33 = vadd.f32 %v1644_v30, %v1643_v27  ;;  %v1756_v35 = vpop.f32.mrb[39].mxu1 }
 0x147   : > { %v1757_v36 = vadd.f32 %v1756_v35, %v1755_v29 }
 0x148   : > { %1325 = vst.msk [vmem:[%s2147_s10 + $0x44] sm:$0xf] %vm1307_vm0, %v1555_v31  ;;  %v1093_v37 = vadd.f32 %v1754_v28, %v932_v32  ;;  %v935_v38 = vadd.f32 %v1645_v33, %v2139_v34 }
 0x14a   : > { %v1165_v39 = vmax.f32 %v1093_v37, 0.0  ;;  %v1096_v40 = vadd.f32 %v1757_v36, %v935_v38  ;;  %v1646_v41 = vpop.f32.mrb[40].mxu0 }
 0x14b   : > { %v1758_v42 = vpop.f32.mrb[40].mxu1  ;;  %v1647_v43 = vpop.f32.mrb[41].mxu0 }
 0x14c   : > { %v1556_v44 = vpack.c.bf16 %v1165_v39, %v1165_v39  ;;  %v1166_v45 = vmax.f32 %v1096_v40, 0.0  ;;  %v1648_v46 = vadd.f32 %v1647_v43, %v1646_v41  ;;  %v1759_v47 = vpop.f32.mrb[41].mxu1  ;;  %v1649_v48 = vpop.f32.mrb[42].mxu0 }
 0x14d   : > { %v1760_v49 = vadd.f32 %v1759_v47, %v1758_v42  ;;  %v1761_v50 = vpop.f32.mrb[42].mxu1  ;;  %v1650_v51 = vpop.f32.mrb[43].mxu0 }
 0x14e   : > { %1326 = vst.msk [vmem:[%s2147_s10 + $0x48] sm:$0xf] %vm1307_vm0, %v1556_v44  ;;  %v1557_v52 = vpack.c.bf16 %v1166_v45, %v1166_v45  ;;  %v940_v53 = vadd.f32 %v1648_v46, %v2139_v34  ;;  %v1651_v54 = vadd.f32 %v1650_v51, %v1649_v48  ;;  %v1762_v55 = vpop.f32.mrb[43].mxu1 }
 0x14f   : > { %v1763_v56 = vadd.f32 %v1762_v55, %v1761_v50 }
 0x150   : > { %1327 = vst.msk [vmem:[%s2147_s10 + $0x4c] sm:$0xf] %vm1307_vm0, %v1557_v52  ;;  %v1101_v57 = vadd.f32 %v1760_v49, %v940_v53  ;;  %v943_v58 = vadd.f32 %v1651_v54, %v2139_v34 }
 0x152   : > { %v1167_v59 = vmax.f32 %v1101_v57, 0.0  ;;  %v1104_v60 = vadd.f32 %v1763_v56, %v943_v58  ;;  %v1652_v61 = vpop.f32.mrb[44].mxu0 }
 0x153   : > { %v1764_v62 = vpop.f32.mrb[44].mxu1  ;;  %v1653_v63 = vpop.f32.mrb[45].mxu0 }
 0x154   : > { %v1558_v0 = vpack.c.bf16 %v1167_v59, %v1167_v59  ;;  %v1168_v1 = vmax.f32 %v1104_v60, 0.0  ;;  %v1654_v2 = vadd.f32 %v1653_v63, %v1652_v61  ;;  %v1765_v3 = vpop.f32.mrb[45].mxu1  ;;  %v1655_v4 = vpop.f32.mrb[46].mxu0 }
 0x155   : > { %v1766_v5 = vadd.f32 %v1765_v3, %v1764_v62  ;;  %v1767_v6 = vpop.f32.mrb[46].mxu1  ;;  %v1656_v7 = vpop.f32.mrb[47].mxu0 }
 0x156   : > { %1328 = vst.msk [vmem:[%s2147_s10 + $0x50] sm:$0xf] %vm1307_vm0, %v1558_v0  ;;  %v1559_v8 = vpack.c.bf16 %v1168_v1, %v1168_v1  ;;  %v948_v9 = vadd.f32 %v1654_v2, %v2139_v34  ;;  %v1657_v10 = vadd.f32 %v1656_v7, %v1655_v4  ;;  %v1768_v11 = vpop.f32.mrb[47].mxu1 }
 0x157   : > { %v1769_v12 = vadd.f32 %v1768_v11, %v1767_v6 }
 0x158   : > { %1329 = vst.msk [vmem:[%s2147_s10 + $0x54] sm:$0xf] %vm1307_vm0, %v1559_v8  ;;  %v1109_v13 = vadd.f32 %v1766_v5, %v948_v9  ;;  %v951_v14 = vadd.f32 %v1657_v10, %v2139_v34 }
 0x15a   : > { %v1169_v15 = vmax.f32 %v1109_v13, 0.0  ;;  %v1112_v16 = vadd.f32 %v1769_v12, %v951_v14  ;;  %v1658_v17 = vpop.f32.mrb[48].mxu0 }
 0x15b   : > { %v1770_v18 = vpop.f32.mrb[48].mxu1  ;;  %v1659_v19 = vpop.f32.mrb[49].mxu0 }
 0x15c   : > { %v1560_v20 = vpack.c.bf16 %v1169_v15, %v1169_v15  ;;  %v1170_v21 = vmax.f32 %v1112_v16, 0.0  ;;  %v1660_v22 = vadd.f32 %v1659_v19, %v1658_v17  ;;  %v1771_v23 = vpop.f32.mrb[49].mxu1  ;;  %v1661_v24 = vpop.f32.mrb[50].mxu0 }
 0x15d   : > { %v1772_v25 = vadd.f32 %v1771_v23, %v1770_v18  ;;  %v1773_v26 = vpop.f32.mrb[50].mxu1  ;;  %v1662_v27 = vpop.f32.mrb[51].mxu0 }
 0x15e   : > { %1330 = vst.msk [vmem:[%s2147_s10 + $0x58] sm:$0xf] %vm1307_vm0, %v1560_v20  ;;  %v1561_v28 = vpack.c.bf16 %v1170_v21, %v1170_v21  ;;  %v956_v29 = vadd.f32 %v1660_v22, %v2139_v34  ;;  %v1663_v30 = vadd.f32 %v1662_v27, %v1661_v24  ;;  %v1774_v31 = vpop.f32.mrb[51].mxu1 }
 0x15f   : > { %v1775_v32 = vadd.f32 %v1774_v31, %v1773_v26 }
 0x160   : > { %1331 = vst.msk [vmem:[%s2147_s10 + $0x5c] sm:$0xf] %vm1307_vm0, %v1561_v28  ;;  %v1117_v33 = vadd.f32 %v1772_v25, %v956_v29  ;;  %v959_v35 = vadd.f32 %v1663_v30, %v2139_v34 }
 0x162   : > { %v1171_v36 = vmax.f32 %v1117_v33, 0.0  ;;  %v1120_v37 = vadd.f32 %v1775_v32, %v959_v35  ;;  %v1664_v38 = vpop.f32.mrb[52].mxu0 }
 0x163   : > { %v1776_v39 = vpop.f32.mrb[52].mxu1  ;;  %v1665_v40 = vpop.f32.mrb[53].mxu0 }
 0x164   : > { %v1562_v41 = vpack.c.bf16 %v1171_v36, %v1171_v36  ;;  %v1172_v42 = vmax.f32 %v1120_v37, 0.0  ;;  %v1666_v43 = vadd.f32 %v1665_v40, %v1664_v38  ;;  %v1777_v44 = vpop.f32.mrb[53].mxu1  ;;  %v1667_v45 = vpop.f32.mrb[54].mxu0 }
 0x165   : > { %v1778_v46 = vadd.f32 %v1777_v44, %v1776_v39  ;;  %v1779_v47 = vpop.f32.mrb[54].mxu1  ;;  %v1668_v48 = vpop.f32.mrb[55].mxu0 }
 0x166   : > { %1332 = vst.msk [vmem:[%s2147_s10 + $0x60] sm:$0xf] %vm1307_vm0, %v1562_v41  ;;  %v1563_v49 = vpack.c.bf16 %v1172_v42, %v1172_v42  ;;  %v964_v50 = vadd.f32 %v1666_v43, %v2139_v34  ;;  %v1669_v51 = vadd.f32 %v1668_v48, %v1667_v45  ;;  %v1780_v52 = vpop.f32.mrb[55].mxu1 }
 0x167   : > { %v1781_v53 = vadd.f32 %v1780_v52, %v1779_v47 }
 0x168   : > { %1333 = vst.msk [vmem:[%s2147_s10 + $0x64] sm:$0xf] %vm1307_vm0, %v1563_v49  ;;  %v1125_v54 = vadd.f32 %v1778_v46, %v964_v50  ;;  %v967_v55 = vadd.f32 %v1669_v51, %v2139_v34 }
 0x16a   : > { %v1173_v56 = vmax.f32 %v1125_v54, 0.0  ;;  %v1128_v57 = vadd.f32 %v1781_v53, %v967_v55  ;;  %v1670_v58 = vpop.f32.mrb[56].mxu0 }
 0x16b   : > { %v1782_v59 = vpop.f32.mrb[56].mxu1  ;;  %v1671_v60 = vpop.f32.mrb[57].mxu0 }
 0x16c   : > { %v1564_v61 = vpack.c.bf16 %v1173_v56, %v1173_v56  ;;  %v1174_v62 = vmax.f32 %v1128_v57, 0.0  ;;  %v1672_v63 = vadd.f32 %v1671_v60, %v1670_v58  ;;  %v1783_v0 = vpop.f32.mrb[57].mxu1  ;;  %v1673_v1 = vpop.f32.mrb[58].mxu0 }
 0x16d   : > { %v1784_v2 = vadd.f32 %v1783_v0, %v1782_v59  ;;  %v1785_v3 = vpop.f32.mrb[58].mxu1  ;;  %v1674_v4 = vpop.f32.mrb[59].mxu0 }
 0x16e   : > { %1334 = vst.msk [vmem:[%s2147_s10 + $0x68] sm:$0xf] %vm1307_vm0, %v1564_v61  ;;  %v1565_v5 = vpack.c.bf16 %v1174_v62, %v1174_v62  ;;  %v972_v6 = vadd.f32 %v1672_v63, %v2139_v34  ;;  %v1675_v7 = vadd.f32 %v1674_v4, %v1673_v1  ;;  %v1786_v8 = vpop.f32.mrb[59].mxu1 }
 0x16f   : > { %v1787_v9 = vadd.f32 %v1786_v8, %v1785_v3 }
 0x170   : > { %1335 = vst.msk [vmem:[%s2147_s10 + $0x6c] sm:$0xf] %vm1307_vm0, %v1565_v5  ;;  %v1133_v10 = vadd.f32 %v1784_v2, %v972_v6  ;;  %v975_v11 = vadd.f32 %v1675_v7, %v2139_v34 }
 0x172   : > { %v1175_v12 = vmax.f32 %v1133_v10, 0.0  ;;  %v1136_v13 = vadd.f32 %v1787_v9, %v975_v11  ;;  %v1676_v14 = vpop.f32.mrb[60].mxu0 }
 0x173   : > { %v1788_v15 = vpop.f32.mrb[60].mxu1  ;;  %v1677_v16 = vpop.f32.mrb[61].mxu0 }
 0x174   : > { %v1566_v17 = vpack.c.bf16 %v1175_v12, %v1175_v12  ;;  %v1176_v18 = vmax.f32 %v1136_v13, 0.0  ;;  %v1678_v19 = vadd.f32 %v1677_v16, %v1676_v14  ;;  %v1789_v20 = vpop.f32.mrb[61].mxu1  ;;  %v1679_v21 = vpop.f32.mrb[62].mxu0 }
 0x175   : > { %v1790_v22 = vadd.f32 %v1789_v20, %v1788_v15  ;;  %v1791_v23 = vpop.f32.mrb[62].mxu1  ;;  %v1680_v24 = vpop.f32.mrb[63].mxu0 }
 0x176   : > { %1336 = vst.msk [vmem:[%s2147_s10 + $0x70] sm:$0xf] %vm1307_vm0, %v1566_v17  ;;  %v1567_v25 = vpack.c.bf16 %v1176_v18, %v1176_v18  ;;  %v980_v26 = vadd.f32 %v1678_v19, %v2139_v34  ;;  %v1681_v27 = vadd.f32 %v1680_v24, %v1679_v21  ;;  %v1792_v28 = vpop.f32.mrb[63].mxu1 }
 0x177   : > { %v1793_v29 = vadd.f32 %v1792_v28, %v1791_v23 }
 0x178   : > { %1337 = vst.msk [vmem:[%s2147_s10 + $0x74] sm:$0xf] %vm1307_vm0, %v1567_v25  ;;  %v1141_v30 = vadd.f32 %v1790_v22, %v980_v26  ;;  %v983_v31 = vadd.f32 %v1681_v27, %v2139_v34 }
 0x17a   : > { %v1177_v32 = vmax.f32 %v1141_v30, 0.0  ;;  %v1144_v33 = vadd.f32 %v1793_v29, %v983_v31 }
 0x17c   : > { %v1568_v35 = vpack.c.bf16 %v1177_v32, %v1177_v32  ;;  %v1178_v36 = vmax.f32 %v1144_v33, 0.0 }
 0x17e   : > { %1338 = vst.msk [vmem:[%s2147_s10 + $0x78] sm:$0xf] %vm1307_vm0, %v1568_v35  ;;  %v1569_v37 = vpack.c.bf16 %v1178_v36, %v1178_v36 }
 0x180   : > { %1339 = vst.msk [vmem:[%s2147_s10 + $0x7c] sm:$0xf] %vm1307_vm0, %v1569_v37 }
 0x181 PF: > { %s13_s12 = sadd.s32 1, %s1936_s12  }
 0x182   : > { %p10_p4 = scmp.ge.s32.totalorder %s13_s12, 7  }
 0x184   :  { %12 = sbr.rel (!%p10_p4) target bundleno = 1 (0x1), region = 62 }

// kernel: conv2dnet_forward.6
= control target key start
LH: loop header
LB: loop body
LE: loop exit
PB: predicated region body
PF: predicated region fallthrough
CT: control target
= control target key end

     0   :  { %vm980_vm0 = vcmask 388096   ;;  %s1837_s1 = inlined_call_operand.vmem [shape: bf16[512,48], index: 1, kind: input, shape index: {}]   ;;  %s1838_s0 = inlined_call_operand.vmem [shape: bf16[200,512], index: 0, kind: input, shape index: {}]   ;;  %s1839_s2 = inlined_call_operand.vmem [shape: f32[1,48], index: 2, kind: input, shape index: {}]   ;;  %s1840_s3 = inlined_call_operand.vmem [shape: bf16[200,48], index: 3, kind: output, shape index: {}]  }
   0x1   :  { %v1333_v0 = vld [vmem:[%s1837_s1 + $0x40] sm:$0xff]   ;;  %v1337_v4 = vld [vmem:[%s1837_s1 + $0x48] sm:$0xff]   ;;  %v1341_v8 = vld [vmem:[%s1837_s1 + $0x50] sm:$0xff]  }
   0x2   :  { %v1334_v1 = vld [vmem:[%s1837_s1 + $0xc0] sm:$0xff]   ;;  %1145 = vmatprep.subr.bf16.mxu0 %v1333_v0  ;;  %v1338_v5 = vld [vmem:[%s1837_s1 + $0xc8] sm:$0xff]   ;;  %v1342_v9 = vld [vmem:[%s1837_s1 + $0xd0] sm:$0xff]  }
   0x3   :  { %v1335_v2 = vld [vmem:[%s1837_s1] sm:$0xff]   ;;  %1239 = vmatprep.subr.bf16.mxu1 %v1334_v1  ;;  %v1339_v6 = vld [vmem:[%s1837_s1 + $0x8] sm:$0xff]   ;;  %v1343_v10 = vld [vmem:[%s1837_s1 + $0x10] sm:$0xff]  }
   0x4   :  { %v1336_v3 = vld [vmem:[%s1837_s1 + $0x80] sm:$0xff]   ;;  %1146 = vmatpush3.bf16.msra.mxu0 %v1335_v2  ;;  %v1340_v7 = vld [vmem:[%s1837_s1 + $0x88] sm:$0xff]   ;;  %v1344_v11 = vld [vmem:[%s1837_s1 + $0x90] sm:$0xff]  }
   0x5   :  { %1240 = vmatpush3.bf16.msra.mxu1 %v1336_v3  ;;  %1147 = vmatprep.subr.bf16.mxu0 %v1337_v4  ;;  %v1345_v12 = vld [vmem:[%s1837_s1 + $0x58] sm:$0xff]   ;;  %v1349_v16 = vld [vmem:[%s1837_s1 + $0x60] sm:$0xff]   ;;  %v1353_v20 = vld [vmem:[%s1837_s1 + $0x68] sm:$0xff]  }
   0x6   :  { %1241 = vmatprep.subr.bf16.mxu1 %v1338_v5  ;;  %v1346_v13 = vld [vmem:[%s1837_s1 + $0xd8] sm:$0xff]   ;;  %v1350_v17 = vld [vmem:[%s1837_s1 + $0xe0] sm:$0xff]   ;;  %v1354_v21 = vld [vmem:[%s1837_s1 + $0xe8] sm:$0xff]  }
   0x7   :  { %v1347_v14 = vld [vmem:[%s1837_s1 + $0x18] sm:$0xff]   ;;  %v1351_v18 = vld [vmem:[%s1837_s1 + $0x20] sm:$0xff]   ;;  %v1355_v22 = vld [vmem:[%s1837_s1 + $0x28] sm:$0xff]  }
   0x8   :  { %1148 = vmatpush3.bf16.msra.mxu0 %v1339_v6  ;;  %v1348_v15 = vld [vmem:[%s1837_s1 + $0x98] sm:$0xff]   ;;  %v1352_v19 = vld [vmem:[%s1837_s1 + $0xa0] sm:$0xff]   ;;  %v1356_v23 = vld [vmem:[%s1837_s1 + $0xa8] sm:$0xff]  }
   0x9   :  { %1242 = vmatpush3.bf16.msra.mxu1 %v1340_v7  ;;  %1149 = vmatprep.subr.bf16.mxu0 %v1341_v8  ;;  %v1357_v24 = vld [vmem:[%s1837_s1 + $0x70] sm:$0xff]   ;;  %v1361_v28 = vld [vmem:[%s1837_s1 + $0x78] sm:$0xff]  }
   0xa   :  { %1243 = vmatprep.subr.bf16.mxu1 %v1342_v9  ;;  %v1358_v25 = vld [vmem:[%s1837_s1 + $0xf0] sm:$0xff]   ;;  %v1362_v29 = vld [vmem:[%s1837_s1 + $0xf8] sm:$0xff]  }
   0xb   :  { %v1359_v26 = vld [vmem:[%s1837_s1 + $0x30] sm:$0xff]   ;;  %v1363_v30 = vld [vmem:[%s1837_s1 + $0x38] sm:$0xff]  }
   0xc   :  { %1150 = vmatpush3.bf16.msra.mxu0 %v1343_v10  ;;  %v1360_v27 = vld [vmem:[%s1837_s1 + $0xb0] sm:$0xff]   ;;  %v1364_v31 = vld [vmem:[%s1837_s1 + $0xb8] sm:$0xff]  }
   0xd   :  { %1244 = vmatpush3.bf16.msra.mxu1 %v1344_v11  ;;  %1151 = vmatprep.subr.bf16.mxu0 %v1345_v12  ;;  %v1365_v32 = vld [vmem:[%s1838_s0] ss:$16 sps:$4 sm:$0xff]   ;;  %v1367_v33 = vld [vmem:[%s1838_s0 + $0x4] ss:$16 sps:$4 sm:$0xff]   ;;  %v1368_v34 = vld [vmem:[%s1838_s0 + $0x8] ss:$16 sps:$4 sm:$0xff]  }
   0xe   :  { %1245 = vmatprep.subr.bf16.mxu1 %v1346_v13  ;;  %v1370_v35 = vld [vmem:[%s1838_s0 + $0xc] ss:$16 sps:$4 sm:$0xff]   ;;  %614 = vmatprep.mubr.bf16.mxu0 %v1367_v33  ;;  %v1371_v36 = vld [vmem:[%s1838_s0 + $0x24] ss:$16 sps:$4 sm:$0xff]   ;;  %v1375_v38 = vld [vmem:[%s1838_s0 + $0x20] ss:$16 sps:$4 sm:$0xff]  }
   0xf   :  { %750 = vmatprep.mubr.bf16.mxu1 %v1370_v35  ;;  %v1373_v37 = vld [vmem:[%s1838_s0 + $0x2c] ss:$16 sps:$4 sm:$0xff]   ;;  %v1376_v39 = vld [vmem:[%s1838_s0 + $0x28] ss:$16 sps:$4 sm:$0xff]   ;;  %v1377_v40 = vld [vmem:[%s1838_s0 + $0x44] ss:$16 sps:$4 sm:$0xff]  }
  0x10   :  { %1152 = vmatpush3.bf16.msra.mxu0 %v1347_v14  ;;  %v1379_v41 = vld [vmem:[%s1838_s0 + $0x4c] ss:$16 sps:$4 sm:$0xff]   ;;  %v1381_v42 = vld [vmem:[%s1838_s0 + $0x40] ss:$16 sps:$4 sm:$0xff]   ;;  %v1382_v43 = vld [vmem:[%s1838_s0 + $0x48] ss:$16 sps:$4 sm:$0xff]  }
  0x11   :  { %1246 = vmatpush3.bf16.msra.mxu1 %v1348_v15  ;;  %1153 = vmatprep.subr.bf16.mxu0 %v1349_v16  ;;  %v1383_v44 = vld [vmem:[%s1838_s0 + $0x64] ss:$16 sps:$4 sm:$0xff]   ;;  %v1385_v45 = vld [vmem:[%s1838_s0 + $0x6c] ss:$16 sps:$4 sm:$0xff]   ;;  %v1387_v46 = vld [vmem:[%s1838_s0 + $0x60] ss:$16 sps:$4 sm:$0xff]  }
  0x12   :  { %1247 = vmatprep.subr.bf16.mxu1 %v1350_v17  ;;  %v1388_v47 = vld [vmem:[%s1838_s0 + $0x68] ss:$16 sps:$4 sm:$0xff]   ;;  %v1389_v48 = vld [vmem:[%s1838_s0 + $0x84] ss:$16 sps:$4 sm:$0xff]   ;;  %v1391_v49 = vld [vmem:[%s1838_s0 + $0x8c] ss:$16 sps:$4 sm:$0xff]  }
  0x13   :  { %v1393_v50 = vld [vmem:[%s1838_s0 + $0x80] ss:$16 sps:$4 sm:$0xff]   ;;  %v1394_v51 = vld [vmem:[%s1838_s0 + $0x88] ss:$16 sps:$4 sm:$0xff]   ;;  %v1395_v52 = vld [vmem:[%s1838_s0 + $0xa4] ss:$16 sps:$4 sm:$0xff]  }
  0x14   :  { %1154 = vmatpush3.bf16.msra.mxu0 %v1351_v18  ;;  %v1397_v53 = vld [vmem:[%s1838_s0 + $0xac] ss:$16 sps:$4 sm:$0xff]   ;;  %v1399_v54 = vld [vmem:[%s1838_s0 + $0xa0] ss:$16 sps:$4 sm:$0xff]   ;;  %v1400_v55 = vld [vmem:[%s1838_s0 + $0xa8] ss:$16 sps:$4 sm:$0xff]  }
  0x15   :  { %1248 = vmatpush3.bf16.msra.mxu1 %v1352_v19  ;;  %1155 = vmatprep.subr.bf16.mxu0 %v1353_v20  ;;  %v1401_v56 = vld [vmem:[%s1838_s0 + $0xc4] ss:$16 sps:$4 sm:$0xff]   ;;  %v1403_v57 = vld [vmem:[%s1838_s0 + $0xcc] ss:$16 sps:$4 sm:$0xff]   ;;  %v1405_v58 = vld [vmem:[%s1838_s0 + $0xc0] ss:$16 sps:$4 sm:$0xff]  }
  0x16   :  { %1249 = vmatprep.subr.bf16.mxu1 %v1354_v21  ;;  %v1406_v59 = vld [vmem:[%s1838_s0 + $0xc8] ss:$16 sps:$4 sm:$0xff]   ;;  %v1407_v60 = vld [vmem:[%s1838_s0 + $0xe4] ss:$16 sps:$4 sm:$0xff]   ;;  %v1409_v61 = vld [vmem:[%s1838_s0 + $0xec] ss:$16 sps:$4 sm:$0xff]  }
  0x17   :  { %v1411_v62 = vld [vmem:[%s1838_s0 + $0xe0] ss:$16 sps:$4 sm:$0xff]   ;;  %v1412_v63 = vld [vmem:[%s1838_s0 + $0xe8] ss:$16 sps:$4 sm:$0xff]   ;;  %v1413_v0 = vld [vmem:[%s1838_s0 + $0x104] ss:$16 sps:$4 sm:$0xff]  }
  0x18   :  { %1156 = vmatpush3.bf16.msra.mxu0 %v1355_v22  ;;  %v1415_v1 = vld [vmem:[%s1838_s0 + $0x10c] ss:$16 sps:$4 sm:$0xff]   ;;  %v1417_v2 = vld [vmem:[%s1838_s0 + $0x100] ss:$16 sps:$4 sm:$0xff]   ;;  %v1418_v3 = vld [vmem:[%s1838_s0 + $0x108] ss:$16 sps:$4 sm:$0xff]  }
  0x19   :  { %1250 = vmatpush3.bf16.msra.mxu1 %v1356_v23  ;;  %1157 = vmatprep.subr.bf16.mxu0 %v1357_v24  ;;  %v1419_v4 = vld [vmem:[%s1838_s0 + $0x124] ss:$16 sps:$4 sm:$0xff]   ;;  %v1421_v5 = vld [vmem:[%s1838_s0 + $0x12c] ss:$16 sps:$4 sm:$0xff]   ;;  %v1423_v6 = vld [vmem:[%s1838_s0 + $0x120] ss:$16 sps:$4 sm:$0xff]  }
  0x1a   :  { %1251 = vmatprep.subr.bf16.mxu1 %v1358_v25  ;;  %v1424_v7 = vld [vmem:[%s1838_s0 + $0x128] ss:$16 sps:$4 sm:$0xff]   ;;  %v1425_v8 = vld [vmem:[%s1838_s0 + $0x144] ss:$16 sps:$4 sm:$0xff]   ;;  %v1427_v9 = vld [vmem:[%s1838_s0 + $0x14c] ss:$16 sps:$4 sm:$0xff]  }
  0x1b   :  { %v1429_v10 = vld [vmem:[%s1838_s0 + $0x140] ss:$16 sps:$4 sm:$0xff]   ;;  %v1430_v11 = vld [vmem:[%s1838_s0 + $0x148] ss:$16 sps:$4 sm:$0xff]   ;;  %v1431_v12 = vld [vmem:[%s1838_s0 + $0x164] ss:$16 sps:$4 sm:$0xff]  }
  0x1c   :  { %1158 = vmatpush3.bf16.msra.mxu0 %v1359_v26  ;;  %v1433_v13 = vld [vmem:[%s1838_s0 + $0x16c] ss:$16 sps:$4 sm:$0xff]   ;;  %v63_v14 = vld [vmem:[%s1838_s0 + $0x180] sm:$0xff]  ;;  %v1436_v17 = vld [vmem:[%s1838_s0 + $0x168] ss:$16 sps:$4 sm:$0xff]  }
  0x1d   :  { %1252 = vmatpush3.bf16.msra.mxu1 %v1360_v27  ;;  %1159 = vmatprep.subr.bf16.mxu0 %v1361_v28  ;;  %v64_v15 = vld [vmem:[%s1838_s0 + $0x188] sm:$0xff]  ;;  %v1435_v16 = vld [vmem:[%s1838_s0 + $0x160] ss:$16 sps:$4 sm:$0xff]   ;;  %v1060_v18 = vcombine.high %v63_v14, %v63_v14  ;;  %v1059_v20 = vcombine.low %v63_v14, %v63_v14 }
  0x1e   :  { %1253 = vmatprep.subr.bf16.mxu1 %v1362_v29  ;;  %v1062_v19 = vcombine.high %v64_v15, %v64_v15  ;;  %v1061_v21 = vcombine.low %v64_v15, %v64_v15  ;;  %v1710_v24 = vld [vmem:[%s1839_s2] ss:$0 sm:$0xff] }
  0x20   :  { %1160 = vmatpush3.bf16.msra.mxu0 %v1363_v30 }
  0x21   :  { %1254 = vmatpush3.bf16.msra.mxu1 %v1364_v31 }
  0x23   :  { %615 = vmatmul.mubr.bf16.vlgmr.msra.gmra.mrb[0].mxu0 %v1365_v32 }
  0x24   :  { %751 = vmatmul.mubr.bf16.vlgmr.msra.gmra.mrb[0].mxu1 %v1368_v34  ;;  %622 = vmatprep.mubr.bf16.mxu0 %v1371_v36 }
  0x25   :  { %758 = vmatprep.mubr.bf16.mxu1 %v1373_v37 }
  0x2b   :  { %623 = vmatmul.mubr.bf16.gmra.mrb[4].mxu0 %v1375_v38 }
  0x2c   :  { %759 = vmatmul.mubr.bf16.gmra.mrb[4].mxu1 %v1376_v39  ;;  %630 = vmatprep.mubr.bf16.mxu0 %v1377_v40 }
  0x2d   :  { %766 = vmatprep.mubr.bf16.mxu1 %v1379_v41 }
  0x33   :  { %631 = vmatmul.mubr.bf16.gmra.mrb[8].mxu0 %v1381_v42 }
  0x34   :  { %767 = vmatmul.mubr.bf16.gmra.mrb[8].mxu1 %v1382_v43  ;;  %638 = vmatprep.mubr.bf16.mxu0 %v1383_v44 }
  0x35   :  { %774 = vmatprep.mubr.bf16.mxu1 %v1385_v45 }
  0x3b   :  { %639 = vmatmul.mubr.bf16.gmra.mrb[12].mxu0 %v1387_v46 }
  0x3c   :  { %775 = vmatmul.mubr.bf16.gmra.mrb[12].mxu1 %v1388_v47  ;;  %646 = vmatprep.mubr.bf16.mxu0 %v1389_v48 }
  0x3d   :  { %782 = vmatprep.mubr.bf16.mxu1 %v1391_v49 }
  0x43   :  { %647 = vmatmul.mubr.bf16.gmra.mrb[16].mxu0 %v1393_v50 }
  0x44   :  { %783 = vmatmul.mubr.bf16.gmra.mrb[16].mxu1 %v1394_v51  ;;  %654 = vmatprep.mubr.bf16.mxu0 %v1395_v52 }
  0x45   :  { %790 = vmatprep.mubr.bf16.mxu1 %v1397_v53 }
  0x4b   :  { %655 = vmatmul.mubr.bf16.gmra.mrb[20].mxu0 %v1399_v54 }
  0x4c   :  { %791 = vmatmul.mubr.bf16.gmra.mrb[20].mxu1 %v1400_v55  ;;  %662 = vmatprep.mubr.bf16.mxu0 %v1401_v56 }
  0x4d   :  { %798 = vmatprep.mubr.bf16.mxu1 %v1403_v57 }
  0x53   :  { %663 = vmatmul.mubr.bf16.gmra.mrb[24].mxu0 %v1405_v58 }
  0x54   :  { %799 = vmatmul.mubr.bf16.gmra.mrb[24].mxu1 %v1406_v59  ;;  %670 = vmatprep.mubr.bf16.mxu0 %v1407_v60 }
  0x55   :  { %806 = vmatprep.mubr.bf16.mxu1 %v1409_v61 }
  0x5b   :  { %671 = vmatmul.mubr.bf16.gmra.mrb[28].mxu0 %v1411_v62 }
  0x5c   :  { %807 = vmatmul.mubr.bf16.gmra.mrb[28].mxu1 %v1412_v63  ;;  %678 = vmatprep.mubr.bf16.mxu0 %v1413_v0 }
  0x5d   :  { %814 = vmatprep.mubr.bf16.mxu1 %v1415_v1 }
  0x63   :  { %679 = vmatmul.mubr.bf16.gmra.mrb[32].mxu0 %v1417_v2 }
  0x64   :  { %815 = vmatmul.mubr.bf16.gmra.mrb[32].mxu1 %v1418_v3  ;;  %686 = vmatprep.mubr.bf16.mxu0 %v1419_v4 }
  0x65   :  { %822 = vmatprep.mubr.bf16.mxu1 %v1421_v5 }
  0x6b   :  { %687 = vmatmul.mubr.bf16.gmra.mrb[36].mxu0 %v1423_v6 }
  0x6c   :  { %823 = vmatmul.mubr.bf16.gmra.mrb[36].mxu1 %v1424_v7  ;;  %694 = vmatprep.mubr.bf16.mxu0 %v1425_v8 }
  0x6d   :  { %830 = vmatprep.mubr.bf16.mxu1 %v1427_v9 }
  0x73   :  { %695 = vmatmul.mubr.bf16.gmra.mrb[40].mxu0 %v1429_v10 }
  0x74   :  { %831 = vmatmul.mubr.bf16.gmra.mrb[40].mxu1 %v1430_v11  ;;  %702 = vmatprep.mubr.bf16.mxu0 %v1431_v12 }
  0x75   :  { %838 = vmatprep.mubr.bf16.mxu1 %v1433_v13 }
  0x7b   :  { %703 = vmatmul.mubr.bf16.gmra.mrb[44].mxu0 %v1435_v16 }
  0x7c   :  { %839 = vmatmul.mubr.bf16.gmra.mrb[44].mxu1 %v1436_v17  ;;  %710 = vmatprep.mubr.bf16.mxu0 %v1060_v18 }
  0x7d   :  { %846 = vmatprep.mubr.bf16.mxu1 %v1062_v19 }
  0x83   :  { %711 = vmatmul.mubr.bf16.gmra.mrb[48].mxu0 %v1059_v20 }
  0x84   :  { %847 = vmatmul.mubr.bf16.gmra.mrb[48].mxu1 %v1061_v21 }
  0xf6   :  { %v1161_v22 = vpop.f32.mrb[0].mxu0 }
  0xf7   :  { %v1255_v23 = vpop.f32.mrb[0].mxu1  ;;  %v1162_v25 = vpop.f32.mrb[1].mxu0 }
  0xf8   :  { %v1163_v26 = vadd.f32 %v1162_v25, %v1161_v22  ;;  %v1256_v27 = vpop.f32.mrb[1].mxu1  ;;  %v1164_v28 = vpop.f32.mrb[2].mxu0 }
  0xf9   :  { %v1257_v29 = vadd.f32 %v1256_v27, %v1255_v23  ;;  %v1258_v30 = vpop.f32.mrb[2].mxu1  ;;  %v1165_v31 = vpop.f32.mrb[3].mxu0 }
  0xfa   :  { %v617_v32 = vadd.f32 %v1163_v26, %v1710_v24  ;;  %v1166_v33 = vadd.f32 %v1165_v31, %v1164_v28  ;;  %v1259_v34 = vpop.f32.mrb[3].mxu1 }
  0xfb   :  { %v1260_v35 = vadd.f32 %v1259_v34, %v1258_v30 }
  0xfc   :  { %v753_v36 = vadd.f32 %v1257_v29, %v617_v32  ;;  %v620_v37 = vadd.f32 %v1166_v33, %v1710_v24 }
  0xfe   :  { %v854_v38 = vmax.f32 %v753_v36, 0.0  ;;  %v756_v39 = vadd.f32 %v1260_v35, %v620_v37  ;;  %v1167_v40 = vpop.f32.mrb[4].mxu0 }
  0xff   :  { %v1261_v41 = vpop.f32.mrb[4].mxu1  ;;  %v1168_v42 = vpop.f32.mrb[5].mxu0 }
 0x100   :  { %v1120_v43 = vpack.c.bf16 %v854_v38, %v854_v38  ;;  %v855_v44 = vmax.f32 %v756_v39, 0.0  ;;  %v1169_v45 = vadd.f32 %v1168_v42, %v1167_v40  ;;  %v1262_v46 = vpop.f32.mrb[5].mxu1  ;;  %v1170_v47 = vpop.f32.mrb[6].mxu0 }
 0x101   :  { %v1263_v48 = vadd.f32 %v1262_v46, %v1261_v41  ;;  %v1264_v49 = vpop.f32.mrb[6].mxu1  ;;  %v1171_v50 = vpop.f32.mrb[7].mxu0 }
 0x102   :  { %981 = vst.msk [vmem:[%s1840_s3] sm:$0xf] %vm980_vm0, %v1120_v43  ;;  %v1121_v51 = vpack.c.bf16 %v855_v44, %v855_v44  ;;  %v625_v52 = vadd.f32 %v1169_v45, %v1710_v24  ;;  %v1172_v53 = vadd.f32 %v1171_v50, %v1170_v47  ;;  %v1265_v54 = vpop.f32.mrb[7].mxu1 }
 0x103   :  { %v1266_v55 = vadd.f32 %v1265_v54, %v1264_v49 }
 0x104   :  { %982 = vst.msk [vmem:[%s1840_s3 + $0x4] sm:$0xf] %vm980_vm0, %v1121_v51  ;;  %v761_v56 = vadd.f32 %v1263_v48, %v625_v52  ;;  %v628_v57 = vadd.f32 %v1172_v53, %v1710_v24 }
 0x106   :  { %v856_v58 = vmax.f32 %v761_v56, 0.0  ;;  %v764_v59 = vadd.f32 %v1266_v55, %v628_v57  ;;  %v1173_v60 = vpop.f32.mrb[8].mxu0 }
 0x107   :  { %v1267_v61 = vpop.f32.mrb[8].mxu1  ;;  %v1174_v62 = vpop.f32.mrb[9].mxu0 }
 0x108   :  { %v1122_v63 = vpack.c.bf16 %v856_v58, %v856_v58  ;;  %v857_v0 = vmax.f32 %v764_v59, 0.0  ;;  %v1175_v1 = vadd.f32 %v1174_v62, %v1173_v60  ;;  %v1268_v2 = vpop.f32.mrb[9].mxu1  ;;  %v1176_v3 = vpop.f32.mrb[10].mxu0 }
 0x109   :  { %v1269_v4 = vadd.f32 %v1268_v2, %v1267_v61  ;;  %v1270_v5 = vpop.f32.mrb[10].mxu1  ;;  %v1177_v6 = vpop.f32.mrb[11].mxu0 }
 0x10a   :  { %983 = vst.msk [vmem:[%s1840_s3 + $0x8] sm:$0xf] %vm980_vm0, %v1122_v63  ;;  %v1123_v7 = vpack.c.bf16 %v857_v0, %v857_v0  ;;  %v633_v8 = vadd.f32 %v1175_v1, %v1710_v24  ;;  %v1178_v9 = vadd.f32 %v1177_v6, %v1176_v3  ;;  %v1271_v10 = vpop.f32.mrb[11].mxu1 }
 0x10b   :  { %v1272_v11 = vadd.f32 %v1271_v10, %v1270_v5 }
 0x10c   :  { %984 = vst.msk [vmem:[%s1840_s3 + $0xc] sm:$0xf] %vm980_vm0, %v1123_v7  ;;  %v769_v12 = vadd.f32 %v1269_v4, %v633_v8  ;;  %v636_v13 = vadd.f32 %v1178_v9, %v1710_v24 }
 0x10e   :  { %v858_v14 = vmax.f32 %v769_v12, 0.0  ;;  %v772_v15 = vadd.f32 %v1272_v11, %v636_v13  ;;  %v1179_v16 = vpop.f32.mrb[12].mxu0 }
 0x10f   :  { %v1273_v17 = vpop.f32.mrb[12].mxu1  ;;  %v1180_v18 = vpop.f32.mrb[13].mxu0 }
 0x110   :  { %v1124_v19 = vpack.c.bf16 %v858_v14, %v858_v14  ;;  %v859_v20 = vmax.f32 %v772_v15, 0.0  ;;  %v1181_v21 = vadd.f32 %v1180_v18, %v1179_v16  ;;  %v1274_v22 = vpop.f32.mrb[13].mxu1  ;;  %v1182_v23 = vpop.f32.mrb[14].mxu0 }
 0x111   :  { %v1275_v25 = vadd.f32 %v1274_v22, %v1273_v17  ;;  %v1276_v26 = vpop.f32.mrb[14].mxu1  ;;  %v1183_v27 = vpop.f32.mrb[15].mxu0 }
 0x112   :  { %985 = vst.msk [vmem:[%s1840_s3 + $0x10] sm:$0xf] %vm980_vm0, %v1124_v19  ;;  %v1125_v28 = vpack.c.bf16 %v859_v20, %v859_v20  ;;  %v641_v29 = vadd.f32 %v1181_v21, %v1710_v24  ;;  %v1184_v30 = vadd.f32 %v1183_v27, %v1182_v23  ;;  %v1277_v31 = vpop.f32.mrb[15].mxu1 }
 0x113   :  { %v1278_v32 = vadd.f32 %v1277_v31, %v1276_v26 }
 0x114   :  { %986 = vst.msk [vmem:[%s1840_s3 + $0x14] sm:$0xf] %vm980_vm0, %v1125_v28  ;;  %v777_v33 = vadd.f32 %v1275_v25, %v641_v29  ;;  %v644_v34 = vadd.f32 %v1184_v30, %v1710_v24 }
 0x116   :  { %v860_v35 = vmax.f32 %v777_v33, 0.0  ;;  %v780_v36 = vadd.f32 %v1278_v32, %v644_v34  ;;  %v1185_v37 = vpop.f32.mrb[16].mxu0 }
 0x117   :  { %v1279_v38 = vpop.f32.mrb[16].mxu1  ;;  %v1186_v39 = vpop.f32.mrb[17].mxu0 }
 0x118   :  { %v1126_v40 = vpack.c.bf16 %v860_v35, %v860_v35  ;;  %v861_v41 = vmax.f32 %v780_v36, 0.0  ;;  %v1187_v42 = vadd.f32 %v1186_v39, %v1185_v37  ;;  %v1280_v43 = vpop.f32.mrb[17].mxu1  ;;  %v1188_v44 = vpop.f32.mrb[18].mxu0 }
 0x119   :  { %v1281_v45 = vadd.f32 %v1280_v43, %v1279_v38  ;;  %v1282_v46 = vpop.f32.mrb[18].mxu1  ;;  %v1189_v47 = vpop.f32.mrb[19].mxu0 }
 0x11a   :  { %987 = vst.msk [vmem:[%s1840_s3 + $0x18] sm:$0xf] %vm980_vm0, %v1126_v40  ;;  %v1127_v48 = vpack.c.bf16 %v861_v41, %v861_v41  ;;  %v649_v49 = vadd.f32 %v1187_v42, %v1710_v24  ;;  %v1190_v50 = vadd.f32 %v1189_v47, %v1188_v44  ;;  %v1283_v51 = vpop.f32.mrb[19].mxu1 }
 0x11b   :  { %v1284_v52 = vadd.f32 %v1283_v51, %v1282_v46 }
 0x11c   :  { %988 = vst.msk [vmem:[%s1840_s3 + $0x1c] sm:$0xf] %vm980_vm0, %v1127_v48  ;;  %v785_v53 = vadd.f32 %v1281_v45, %v649_v49  ;;  %v652_v54 = vadd.f32 %v1190_v50, %v1710_v24 }
 0x11e   :  { %v862_v55 = vmax.f32 %v785_v53, 0.0  ;;  %v788_v56 = vadd.f32 %v1284_v52, %v652_v54  ;;  %v1191_v57 = vpop.f32.mrb[20].mxu0 }
 0x11f   :  { %v1285_v58 = vpop.f32.mrb[20].mxu1  ;;  %v1192_v59 = vpop.f32.mrb[21].mxu0 }
 0x120   :  { %v1128_v60 = vpack.c.bf16 %v862_v55, %v862_v55  ;;  %v863_v61 = vmax.f32 %v788_v56, 0.0  ;;  %v1193_v62 = vadd.f32 %v1192_v59, %v1191_v57  ;;  %v1286_v63 = vpop.f32.mrb[21].mxu1  ;;  %v1194_v0 = vpop.f32.mrb[22].mxu0 }
 0x121   :  { %v1287_v1 = vadd.f32 %v1286_v63, %v1285_v58  ;;  %v1288_v2 = vpop.f32.mrb[22].mxu1  ;;  %v1195_v3 = vpop.f32.mrb[23].mxu0 }
 0x122   :  { %989 = vst.msk [vmem:[%s1840_s3 + $0x20] sm:$0xf] %vm980_vm0, %v1128_v60  ;;  %v1129_v4 = vpack.c.bf16 %v863_v61, %v863_v61  ;;  %v657_v5 = vadd.f32 %v1193_v62, %v1710_v24  ;;  %v1196_v6 = vadd.f32 %v1195_v3, %v1194_v0  ;;  %v1289_v7 = vpop.f32.mrb[23].mxu1 }
 0x123   :  { %v1290_v8 = vadd.f32 %v1289_v7, %v1288_v2 }
 0x124   :  { %990 = vst.msk [vmem:[%s1840_s3 + $0x24] sm:$0xf] %vm980_vm0, %v1129_v4  ;;  %v793_v9 = vadd.f32 %v1287_v1, %v657_v5  ;;  %v660_v10 = vadd.f32 %v1196_v6, %v1710_v24 }
 0x126   :  { %v864_v11 = vmax.f32 %v793_v9, 0.0  ;;  %v796_v12 = vadd.f32 %v1290_v8, %v660_v10  ;;  %v1197_v13 = vpop.f32.mrb[24].mxu0 }
 0x127   :  { %v1291_v14 = vpop.f32.mrb[24].mxu1  ;;  %v1198_v15 = vpop.f32.mrb[25].mxu0 }
 0x128   :  { %v1130_v16 = vpack.c.bf16 %v864_v11, %v864_v11  ;;  %v865_v17 = vmax.f32 %v796_v12, 0.0  ;;  %v1199_v18 = vadd.f32 %v1198_v15, %v1197_v13  ;;  %v1292_v19 = vpop.f32.mrb[25].mxu1  ;;  %v1200_v20 = vpop.f32.mrb[26].mxu0 }
 0x129   :  { %v1293_v21 = vadd.f32 %v1292_v19, %v1291_v14  ;;  %v1294_v22 = vpop.f32.mrb[26].mxu1  ;;  %v1201_v23 = vpop.f32.mrb[27].mxu0 }
 0x12a   :  { %991 = vst.msk [vmem:[%s1840_s3 + $0x28] sm:$0xf] %vm980_vm0, %v1130_v16  ;;  %v1131_v25 = vpack.c.bf16 %v865_v17, %v865_v17  ;;  %v665_v26 = vadd.f32 %v1199_v18, %v1710_v24  ;;  %v1202_v27 = vadd.f32 %v1201_v23, %v1200_v20  ;;  %v1295_v28 = vpop.f32.mrb[27].mxu1 }
 0x12b   :  { %v1296_v29 = vadd.f32 %v1295_v28, %v1294_v22 }
 0x12c   :  { %992 = vst.msk [vmem:[%s1840_s3 + $0x2c] sm:$0xf] %vm980_vm0, %v1131_v25  ;;  %v801_v30 = vadd.f32 %v1293_v21, %v665_v26  ;;  %v668_v31 = vadd.f32 %v1202_v27, %v1710_v24 }
 0x12e   :  { %v866_v32 = vmax.f32 %v801_v30, 0.0  ;;  %v804_v33 = vadd.f32 %v1296_v29, %v668_v31  ;;  %v1203_v34 = vpop.f32.mrb[28].mxu0 }
 0x12f   :  { %v1297_v35 = vpop.f32.mrb[28].mxu1  ;;  %v1204_v36 = vpop.f32.mrb[29].mxu0 }
 0x130   :  { %v1132_v37 = vpack.c.bf16 %v866_v32, %v866_v32  ;;  %v867_v38 = vmax.f32 %v804_v33, 0.0  ;;  %v1205_v39 = vadd.f32 %v1204_v36, %v1203_v34  ;;  %v1298_v40 = vpop.f32.mrb[29].mxu1  ;;  %v1206_v41 = vpop.f32.mrb[30].mxu0 }
 0x131   :  { %v1299_v42 = vadd.f32 %v1298_v40, %v1297_v35  ;;  %v1300_v43 = vpop.f32.mrb[30].mxu1  ;;  %v1207_v44 = vpop.f32.mrb[31].mxu0 }
 0x132   :  { %993 = vst.msk [vmem:[%s1840_s3 + $0x30] sm:$0xf] %vm980_vm0, %v1132_v37  ;;  %v1133_v45 = vpack.c.bf16 %v867_v38, %v867_v38  ;;  %v673_v46 = vadd.f32 %v1205_v39, %v1710_v24  ;;  %v1208_v47 = vadd.f32 %v1207_v44, %v1206_v41  ;;  %v1301_v48 = vpop.f32.mrb[31].mxu1 }
 0x133   :  { %v1302_v49 = vadd.f32 %v1301_v48, %v1300_v43 }
 0x134   :  { %994 = vst.msk [vmem:[%s1840_s3 + $0x34] sm:$0xf] %vm980_vm0, %v1133_v45  ;;  %v809_v50 = vadd.f32 %v1299_v42, %v673_v46  ;;  %v676_v51 = vadd.f32 %v1208_v47, %v1710_v24 }
 0x136   :  { %v868_v52 = vmax.f32 %v809_v50, 0.0  ;;  %v812_v53 = vadd.f32 %v1302_v49, %v676_v51  ;;  %v1209_v54 = vpop.f32.mrb[32].mxu0 }
 0x137   :  { %v1303_v55 = vpop.f32.mrb[32].mxu1  ;;  %v1210_v56 = vpop.f32.mrb[33].mxu0 }
 0x138   :  { %v1134_v57 = vpack.c.bf16 %v868_v52, %v868_v52  ;;  %v869_v58 = vmax.f32 %v812_v53, 0.0  ;;  %v1211_v59 = vadd.f32 %v1210_v56, %v1209_v54  ;;  %v1304_v60 = vpop.f32.mrb[33].mxu1  ;;  %v1212_v61 = vpop.f32.mrb[34].mxu0 }
 0x139   :  { %v1305_v62 = vadd.f32 %v1304_v60, %v1303_v55  ;;  %v1306_v63 = vpop.f32.mrb[34].mxu1  ;;  %v1213_v0 = vpop.f32.mrb[35].mxu0 }
 0x13a   :  { %995 = vst.msk [vmem:[%s1840_s3 + $0x38] sm:$0xf] %vm980_vm0, %v1134_v57  ;;  %v1135_v1 = vpack.c.bf16 %v869_v58, %v869_v58  ;;  %v681_v2 = vadd.f32 %v1211_v59, %v1710_v24  ;;  %v1214_v3 = vadd.f32 %v1213_v0, %v1212_v61  ;;  %v1307_v4 = vpop.f32.mrb[35].mxu1 }
 0x13b   :  { %v1308_v5 = vadd.f32 %v1307_v4, %v1306_v63 }
 0x13c   :  { %996 = vst.msk [vmem:[%s1840_s3 + $0x3c] sm:$0xf] %vm980_vm0, %v1135_v1  ;;  %v817_v6 = vadd.f32 %v1305_v62, %v681_v2  ;;  %v684_v7 = vadd.f32 %v1214_v3, %v1710_v24 }
 0x13e   :  { %v870_v8 = vmax.f32 %v817_v6, 0.0  ;;  %v820_v9 = vadd.f32 %v1308_v5, %v684_v7  ;;  %v1215_v10 = vpop.f32.mrb[36].mxu0 }
 0x13f   :  { %v1309_v11 = vpop.f32.mrb[36].mxu1  ;;  %v1216_v12 = vpop.f32.mrb[37].mxu0 }
 0x140   :  { %v1136_v13 = vpack.c.bf16 %v870_v8, %v870_v8  ;;  %v871_v14 = vmax.f32 %v820_v9, 0.0  ;;  %v1217_v15 = vadd.f32 %v1216_v12, %v1215_v10  ;;  %v1310_v16 = vpop.f32.mrb[37].mxu1  ;;  %v1218_v17 = vpop.f32.mrb[38].mxu0 }
 0x141   :  { %v1311_v18 = vadd.f32 %v1310_v16, %v1309_v11  ;;  %v1312_v19 = vpop.f32.mrb[38].mxu1  ;;  %v1219_v20 = vpop.f32.mrb[39].mxu0 }
 0x142   :  { %997 = vst.msk [vmem:[%s1840_s3 + $0x40] sm:$0xf] %vm980_vm0, %v1136_v13  ;;  %v1137_v21 = vpack.c.bf16 %v871_v14, %v871_v14  ;;  %v689_v22 = vadd.f32 %v1217_v15, %v1710_v24  ;;  %v1220_v23 = vadd.f32 %v1219_v20, %v1218_v17  ;;  %v1313_v25 = vpop.f32.mrb[39].mxu1 }
 0x143   :  { %v1314_v26 = vadd.f32 %v1313_v25, %v1312_v19 }
 0x144   :  { %998 = vst.msk [vmem:[%s1840_s3 + $0x44] sm:$0xf] %vm980_vm0, %v1137_v21  ;;  %v825_v27 = vadd.f32 %v1311_v18, %v689_v22  ;;  %v692_v28 = vadd.f32 %v1220_v23, %v1710_v24 }
 0x146   :  { %v872_v29 = vmax.f32 %v825_v27, 0.0  ;;  %v828_v30 = vadd.f32 %v1314_v26, %v692_v28  ;;  %v1221_v31 = vpop.f32.mrb[40].mxu0 }
 0x147   :  { %v1315_v32 = vpop.f32.mrb[40].mxu1  ;;  %v1222_v33 = vpop.f32.mrb[41].mxu0 }
 0x148   :  { %v1138_v34 = vpack.c.bf16 %v872_v29, %v872_v29  ;;  %v873_v35 = vmax.f32 %v828_v30, 0.0  ;;  %v1223_v36 = vadd.f32 %v1222_v33, %v1221_v31  ;;  %v1316_v37 = vpop.f32.mrb[41].mxu1  ;;  %v1224_v38 = vpop.f32.mrb[42].mxu0 }
 0x149   :  { %v1317_v39 = vadd.f32 %v1316_v37, %v1315_v32  ;;  %v1318_v40 = vpop.f32.mrb[42].mxu1  ;;  %v1225_v41 = vpop.f32.mrb[43].mxu0 }
 0x14a   :  { %999 = vst.msk [vmem:[%s1840_s3 + $0x48] sm:$0xf] %vm980_vm0, %v1138_v34  ;;  %v1139_v42 = vpack.c.bf16 %v873_v35, %v873_v35  ;;  %v697_v43 = vadd.f32 %v1223_v36, %v1710_v24  ;;  %v1226_v44 = vadd.f32 %v1225_v41, %v1224_v38  ;;  %v1319_v45 = vpop.f32.mrb[43].mxu1 }
 0x14b   :  { %v1320_v46 = vadd.f32 %v1319_v45, %v1318_v40 }
 0x14c   :  { %1000 = vst.msk [vmem:[%s1840_s3 + $0x4c] sm:$0xf] %vm980_vm0, %v1139_v42  ;;  %v833_v47 = vadd.f32 %v1317_v39, %v697_v43  ;;  %v700_v48 = vadd.f32 %v1226_v44, %v1710_v24 }
 0x14e   :  { %v874_v49 = vmax.f32 %v833_v47, 0.0  ;;  %v836_v50 = vadd.f32 %v1320_v46, %v700_v48  ;;  %v1227_v51 = vpop.f32.mrb[44].mxu0 }
 0x14f   :  { %v1321_v52 = vpop.f32.mrb[44].mxu1  ;;  %v1228_v53 = vpop.f32.mrb[45].mxu0 }
 0x150   :  { %v1140_v54 = vpack.c.bf16 %v874_v49, %v874_v49  ;;  %v875_v55 = vmax.f32 %v836_v50, 0.0  ;;  %v1229_v56 = vadd.f32 %v1228_v53, %v1227_v51  ;;  %v1322_v57 = vpop.f32.mrb[45].mxu1  ;;  %v1230_v58 = vpop.f32.mrb[46].mxu0 }
 0x151   :  { %v1323_v59 = vadd.f32 %v1322_v57, %v1321_v52  ;;  %v1324_v60 = vpop.f32.mrb[46].mxu1  ;;  %v1231_v61 = vpop.f32.mrb[47].mxu0 }
 0x152   :  { %1001 = vst.msk [vmem:[%s1840_s3 + $0x50] sm:$0xf] %vm980_vm0, %v1140_v54  ;;  %v1141_v62 = vpack.c.bf16 %v875_v55, %v875_v55  ;;  %v705_v63 = vadd.f32 %v1229_v56, %v1710_v24  ;;  %v1232_v0 = vadd.f32 %v1231_v61, %v1230_v58  ;;  %v1325_v1 = vpop.f32.mrb[47].mxu1 }
 0x153   :  { %v1326_v2 = vadd.f32 %v1325_v1, %v1324_v60 }
 0x154   :  { %1002 = vst.msk [vmem:[%s1840_s3 + $0x54] sm:$0xf] %vm980_vm0, %v1141_v62  ;;  %v841_v3 = vadd.f32 %v1323_v59, %v705_v63  ;;  %v708_v4 = vadd.f32 %v1232_v0, %v1710_v24 }
 0x156   :  { %v876_v5 = vmax.f32 %v841_v3, 0.0  ;;  %v844_v6 = vadd.f32 %v1326_v2, %v708_v4  ;;  %v1233_v7 = vpop.f32.mrb[48].mxu0 }
 0x157   :  { %v1327_v8 = vpop.f32.mrb[48].mxu1  ;;  %v1234_v9 = vpop.f32.mrb[49].mxu0 }
 0x158   :  { %v1142_v10 = vpack.c.bf16 %v876_v5, %v876_v5  ;;  %v877_v11 = vmax.f32 %v844_v6, 0.0  ;;  %v1235_v12 = vadd.f32 %v1234_v9, %v1233_v7  ;;  %v1328_v13 = vpop.f32.mrb[49].mxu1  ;;  %v1236_v14 = vpop.f32.mrb[50].mxu0 }
 0x159   :  { %v1329_v15 = vadd.f32 %v1328_v13, %v1327_v8  ;;  %v1330_v16 = vpop.f32.mrb[50].mxu1  ;;  %v1237_v17 = vpop.f32.mrb[51].mxu0 }
 0x15a   :  { %1003 = vst.msk [vmem:[%s1840_s3 + $0x58] sm:$0xf] %vm980_vm0, %v1142_v10  ;;  %v1143_v18 = vpack.c.bf16 %v877_v11, %v877_v11  ;;  %v713_v19 = vadd.f32 %v1235_v12, %v1710_v24  ;;  %v1331_v20 = vpop.f32.mrb[51].mxu1 }
 0x15c   :  { %1004 = vst.msk [vmem:[%s1840_s3 + $0x5c] sm:$0xf] %vm980_vm0, %v1143_v18  ;;  %v849_v21 = vadd.f32 %v1329_v15, %v713_v19 }
 0x15e   :  { %v878_v22 = vmax.f32 %v849_v21, 0.0 }
 0x160   :  { %v1144_v23 = vpack.c.bf16 %v878_v22, %v878_v22 }
 0x162   :  { %1005 = vst.msk [vmem:[%s1840_s3 + $0x60] sm:$0xf] %vm980_vm0, %v1144_v23 }

// kernel: conv2dnet_forward.7
= control target key start
LH: loop header
LB: loop body
LE: loop exit
PB: predicated region body
PF: predicated region fallthrough
CT: control target
= control target key end

     0   :  { %vm674_vm0 = vcmask 392192   ;;  %s1879_s0 = inlined_call_operand.vmem [shape: bf16[8,1200], index: 0, kind: input, shape index: {}]   ;;  %s1880_s1 = inlined_call_operand.vmem [shape: bf16[1200,108], index: 1, kind: input, shape index: {}]   ;;  %s1881_s2 = inlined_call_operand.vmem [shape: f32[1,108], index: 2, kind: input, shape index: {}]   ;;  %s1882_s3 = inlined_call_operand.vmem [shape: bf16[108,108], index: 3, kind: input, shape index: {}]   ;;  %s1883_s4 = inlined_call_operand.vmem [shape: f32[1,108], index: 4, kind: input, shape index: {}]   ;;  %s1884_s5 = inlined_call_operand.vmem [shape: bf16[108,128], index: 5, kind: input, shape index: {}]   ;;  %s1885_s6 = inlined_call_operand.vmem [shape: f32[1,128], index: 6, kind: input, shape index: {}]   ;;  %s1886_s7 = inlined_call_operand.hbm [shape: f32[8,128], index: 7, kind: output, shape index: {}]  }
   0x1   :  { %v1383_v0 = vld [vmem:[%s1880_s1 + $0x40] sm:$0xff]   ;;  %v1387_v4 = vld [vmem:[%s1880_s1 + $0x48] sm:$0xff]   ;;  %v1391_v8 = vld [vmem:[%s1880_s1 + $0x50] sm:$0xff]  }
   0x2   :  { %v1384_v1 = vld [vmem:[%s1880_s1] sm:$0xff]   ;;  %1239 = vmatprep.subr.bf16.mxu0 %v1383_v0  ;;  %v1388_v5 = vld [vmem:[%s1880_s1 + $0x8] sm:$0xff]   ;;  %v1392_v9 = vld [vmem:[%s1880_s1 + $0x10] sm:$0xff]  }
   0x3   :  { %v1385_v2 = vld [vmem:[%s1880_s1 + $0xc0] sm:$0xff]   ;;  %1240 = vmatpush3.bf16.msra.mxu0 %v1384_v1  ;;  %v1389_v6 = vld [vmem:[%s1880_s1 + $0xc8] sm:$0xff]   ;;  %v1393_v10 = vld [vmem:[%s1880_s1 + $0xd0] sm:$0xff]  }
   0x4   :  { %v1386_v3 = vld [vmem:[%s1880_s1 + $0x80] sm:$0xff]   ;;  %1261 = vmatprep.subr.bf16.mxu1 %v1385_v2  ;;  %1241 = vmatprep.subr.bf16.mxu0 %v1387_v4  ;;  %v1390_v7 = vld [vmem:[%s1880_s1 + $0x88] sm:$0xff]   ;;  %v1394_v11 = vld [vmem:[%s1880_s1 + $0x90] sm:$0xff]  }
   0x5   :  { %1262 = vmatpush3.bf16.msra.mxu1 %v1386_v3  ;;  %v1395_v12 = vld [vmem:[%s1880_s1 + $0x58] sm:$0xff]   ;;  %v1399_v16 = vld [vmem:[%s1880_s1 + $0x60] sm:$0xff]   ;;  %v1403_v20 = vld [vmem:[%s1880_s1 + $0x68] sm:$0xff]  }
   0x6   :  { %1263 = vmatprep.subr.bf16.mxu1 %v1389_v6  ;;  %v1396_v13 = vld [vmem:[%s1880_s1 + $0x18] sm:$0xff]   ;;  %v1400_v17 = vld [vmem:[%s1880_s1 + $0x20] sm:$0xff]   ;;  %v1404_v21 = vld [vmem:[%s1880_s1 + $0x28] sm:$0xff]  }
   0x7   :  { %1242 = vmatpush3.bf16.msra.mxu0 %v1388_v5  ;;  %v1397_v14 = vld [vmem:[%s1880_s1 + $0xd8] sm:$0xff]   ;;  %v1401_v18 = vld [vmem:[%s1880_s1 + $0xe0] sm:$0xff]   ;;  %v1405_v22 = vld [vmem:[%s1880_s1 + $0xe8] sm:$0xff]  }
   0x8   :  { %1243 = vmatprep.subr.bf16.mxu0 %v1391_v8  ;;  %v1398_v15 = vld [vmem:[%s1880_s1 + $0x98] sm:$0xff]   ;;  %v1402_v19 = vld [vmem:[%s1880_s1 + $0xa0] sm:$0xff]   ;;  %v1406_v23 = vld [vmem:[%s1880_s1 + $0xa8] sm:$0xff]  }
   0x9   :  { %1264 = vmatpush3.bf16.msra.mxu1 %v1390_v7  ;;  %v1407_v24 = vld [vmem:[%s1880_s1 + $0x70] sm:$0xff]   ;;  %v1411_v28 = vld [vmem:[%s1880_s1 + $0x78] sm:$0xff]   ;;  %v28_v31 = vld [vmem:[%s1879_s0] sm:$0xff] }
   0xa   :  { %1265 = vmatprep.subr.bf16.mxu1 %v1393_v10  ;;  %v1408_v25 = vld [vmem:[%s1880_s1 + $0x30] sm:$0xff]   ;;  %v1412_v29 = vld [vmem:[%s1880_s1 + $0x38] sm:$0xff]   ;;  %v1135_v32 = vcombine.low %v28_v31, %v28_v31  ;;  %v1136_v33 = vcombine.high %v28_v31, %v28_v31  ;;  %v1417_v35 = vld [vmem:[%s1880_s1 + $0x140] sm:$0xff]  }
   0xb   :  { %1244 = vmatpush3.bf16.msra.mxu0 %v1392_v9  ;;  %v1409_v26 = vld [vmem:[%s1880_s1 + $0xf0] sm:$0xff]   ;;  %v1413_v30 = vld [vmem:[%s1880_s1 + $0xf8] sm:$0xff]   ;;  %v29_v36 = vld [vmem:[%s1879_s0 + $0x8] sm:$0xff]  ;;  %v1510_v9 = vmov 0  }
   0xc   :  { %1245 = vmatprep.subr.bf16.mxu0 %v1395_v12  ;;  %v1410_v27 = vld [vmem:[%s1880_s1 + $0xb0] sm:$0xff]   ;;  %v1416_v34 = vld [vmem:[%s1880_s1 + $0xb8] sm:$0xff]   ;;  %710 = vmatprep.mubr.bf16.mxu0 %v1136_v33  ;;  %v1137_v37 = vcombine.low %v29_v36, %v29_v36  ;;  %v1138_v38 = vcombine.high %v29_v36, %v29_v36  ;;  %v1420_v39 = vld [vmem:[%s1880_s1 + $0x100] sm:$0xff]  }
   0xd   :  { %1266 = vmatpush3.bf16.msra.mxu1 %v1394_v11  ;;  %v1421_v40 = vld [vmem:[%s1880_s1 + $0x1c0] sm:$0xff]   ;;  %v1423_v42 = vld [vmem:[%s1880_s1 + $0x148] sm:$0xff]   ;;  %v1427_v46 = vld [vmem:[%s1880_s1 + $0x150] sm:$0xff]  }
   0xe   :  { %1267 = vmatprep.subr.bf16.mxu1 %v1397_v14  ;;  %750 = vmatprep.mubr.bf16.mxu1 %v1138_v38  ;;  %v1422_v41 = vld [vmem:[%s1880_s1 + $0x180] sm:$0xff]   ;;  %v1424_v43 = vld [vmem:[%s1880_s1 + $0x108] sm:$0xff]   ;;  %v1428_v47 = vld [vmem:[%s1880_s1 + $0x110] sm:$0xff]  }
   0xf   :  { %1246 = vmatpush3.bf16.msra.mxu0 %v1396_v13  ;;  %v1425_v44 = vld [vmem:[%s1880_s1 + $0x1c8] sm:$0xff]   ;;  %v1429_v48 = vld [vmem:[%s1880_s1 + $0x1d0] sm:$0xff]   ;;  %v1431_v50 = vld [vmem:[%s1880_s1 + $0x158] sm:$0xff]  }
  0x10   :  { %1247 = vmatprep.subr.bf16.mxu0 %v1399_v16  ;;  %v1426_v45 = vld [vmem:[%s1880_s1 + $0x188] sm:$0xff]   ;;  %v1430_v49 = vld [vmem:[%s1880_s1 + $0x190] sm:$0xff]   ;;  %v1432_v51 = vld [vmem:[%s1880_s1 + $0x118] sm:$0xff]  }
  0x11   :  { %1268 = vmatpush3.bf16.msra.mxu1 %v1398_v15  ;;  %v1433_v52 = vld [vmem:[%s1880_s1 + $0x1d8] sm:$0xff]   ;;  %v1435_v54 = vld [vmem:[%s1880_s1 + $0x160] sm:$0xff]   ;;  %v1439_v58 = vld [vmem:[%s1880_s1 + $0x168] sm:$0xff]  }
  0x12   :  { %1269 = vmatprep.subr.bf16.mxu1 %v1401_v18  ;;  %v1434_v53 = vld [vmem:[%s1880_s1 + $0x198] sm:$0xff]   ;;  %v1436_v55 = vld [vmem:[%s1880_s1 + $0x120] sm:$0xff]   ;;  %v1440_v59 = vld [vmem:[%s1880_s1 + $0x128] sm:$0xff]  }
  0x13   :  { %1248 = vmatpush3.bf16.msra.mxu0 %v1400_v17  ;;  %v1437_v56 = vld [vmem:[%s1880_s1 + $0x1e0] sm:$0xff]   ;;  %v1441_v60 = vld [vmem:[%s1880_s1 + $0x1e8] sm:$0xff]   ;;  %v1443_v62 = vld [vmem:[%s1880_s1 + $0x170] sm:$0xff]  }
  0x14   :  { %1249 = vmatprep.subr.bf16.mxu0 %v1403_v20  ;;  %v1438_v57 = vld [vmem:[%s1880_s1 + $0x1a0] sm:$0xff]   ;;  %v1442_v61 = vld [vmem:[%s1880_s1 + $0x1a8] sm:$0xff]   ;;  %v1444_v63 = vld [vmem:[%s1880_s1 + $0x130] sm:$0xff]  }
  0x15   :  { %1270 = vmatpush3.bf16.msra.mxu1 %v1402_v19  ;;  %v1445_v0 = vld [vmem:[%s1880_s1 + $0x1f0] sm:$0xff]   ;;  %v1447_v2 = vld [vmem:[%s1880_s1 + $0x178] sm:$0xff]   ;;  %v1455_v13 = vld [vmem:[%s1880_s1 + $0x200] sm:$0xff]  }
  0x16   :  { %1271 = vmatprep.subr.bf16.mxu1 %v1405_v22  ;;  %v1446_v1 = vld [vmem:[%s1880_s1 + $0x1b0] sm:$0xff]   ;;  %v1448_v3 = vld [vmem:[%s1880_s1 + $0x138] sm:$0xff]   ;;  %v1456_v14 = vld [vmem:[%s1880_s1 + $0x208] sm:$0xff]  }
  0x17   :  { %1250 = vmatpush3.bf16.msra.mxu0 %v1404_v21  ;;  %v1449_v4 = vld [vmem:[%s1880_s1 + $0x1f8] sm:$0xff]   ;;  %v30_v5 = vld [vmem:[%s1879_s0 + $0x10] sm:$0xff]  ;;  %v32_v17 = vld [vmem:[%s1879_s0 + $0x20] sm:$0xff] }
  0x18   :  { %1251 = vmatprep.subr.bf16.mxu0 %v1407_v24  ;;  %v1139_v6 = vcombine.low %v30_v5, %v30_v5  ;;  %v1140_v7 = vcombine.high %v30_v5, %v30_v5  ;;  %v1452_v8 = vld [vmem:[%s1880_s1 + $0x1b8] sm:$0xff]   ;;  %v1457_v15 = vld [vmem:[%s1880_s1 + $0x210] sm:$0xff]   ;;  %v1144_v18 = vcombine.high %v32_v17, %v32_v17  ;;  %v1459_v19 = vld [vmem:[%s1880_s1 + $0x220] sm:$0xff]  }
  0x19   :  { %1272 = vmatpush3.bf16.msra.mxu1 %v1406_v23  ;;  %v31_v10 = vld [vmem:[%s1879_s0 + $0x18] sm:$0xff]  ;;  %v1460_v20 = vld [vmem:[%s1880_s1 + $0x228] sm:$0xff]  }
  0x1a   :  { %1273 = vmatprep.subr.bf16.mxu1 %v1409_v26  ;;  %v1141_v11 = vcombine.low %v31_v10, %v31_v10  ;;  %v1142_v12 = vcombine.high %v31_v10, %v31_v10  ;;  %v1458_v16 = vld [vmem:[%s1880_s1 + $0x218] sm:$0xff]  }
  0x1b   :  { %1252 = vmatpush3.bf16.msra.mxu0 %v1408_v25 }
  0x1c   :  { %1253 = vmatprep.subr.bf16.mxu0 %v1411_v28 }
  0x1d   :  { %1274 = vmatpush3.bf16.msra.mxu1 %v1410_v27 }
  0x1e   :  { %1275 = vmatprep.subr.bf16.mxu1 %v1413_v30 }
  0x1f   :  { %1254 = vmatpush3.bf16.msra.mxu0 %v1412_v29 }
  0x20   :  { %1283 = vmatprep.subr.bf16.mxu0 %v1417_v35 }
  0x21   :  { %1276 = vmatpush3.bf16.msra.mxu1 %v1416_v34 }
  0x22   :  { %711 = vmatmul.mubr.bf16.vlgmr.msra.gmra.mrb[0].mxu0 %v1135_v32  ;;  %1305 = vmatprep.subr.bf16.mxu1 %v1421_v40 }
  0x23   :  { %1284 = vmatpush3.bf16.msra.mxu0 %v1420_v39  ;;  %790 = vmatprep.mubr.bf16.mxu0 %v1140_v7 }
  0x24   :  { %751 = vmatmul.mubr.bf16.vlgmr.msra.gmra.mrb[0].mxu1 %v1137_v37  ;;  %1285 = vmatprep.subr.bf16.mxu0 %v1423_v42 }
  0x25   :  { %1306 = vmatpush3.bf16.msra.mxu1 %v1422_v41  ;;  %830 = vmatprep.mubr.bf16.mxu1 %v1142_v12 }
  0x26   :  { %1307 = vmatprep.subr.bf16.mxu1 %v1425_v44 }
  0x27   :  { %1286 = vmatpush3.bf16.msra.mxu0 %v1424_v43 }
  0x28   :  { %1287 = vmatprep.subr.bf16.mxu0 %v1427_v46 }
  0x29   :  { %1308 = vmatpush3.bf16.msra.mxu1 %v1426_v45 }
  0x2a   :  { %1309 = vmatprep.subr.bf16.mxu1 %v1429_v48 }
  0x2b   :  { %1288 = vmatpush3.bf16.msra.mxu0 %v1428_v47 }
  0x2c   :  { %1289 = vmatprep.subr.bf16.mxu0 %v1431_v50 }
  0x2d   :  { %1310 = vmatpush3.bf16.msra.mxu1 %v1430_v49 }
  0x2e   :  { %1311 = vmatprep.subr.bf16.mxu1 %v1433_v52 }
  0x2f   :  { %1290 = vmatpush3.bf16.msra.mxu0 %v1432_v51 }
  0x30   :  { %1291 = vmatprep.subr.bf16.mxu0 %v1435_v54 }
  0x31   :  { %1312 = vmatpush3.bf16.msra.mxu1 %v1434_v53 }
  0x32   :  { %1313 = vmatprep.subr.bf16.mxu1 %v1437_v56 }
  0x33   :  { %1292 = vmatpush3.bf16.msra.mxu0 %v1436_v55 }
  0x34   :  { %1293 = vmatprep.subr.bf16.mxu0 %v1439_v58 }
  0x35   :  { %1314 = vmatpush3.bf16.msra.mxu1 %v1438_v57 }
  0x36   :  { %1315 = vmatprep.subr.bf16.mxu1 %v1441_v60 }
  0x37   :  { %1294 = vmatpush3.bf16.msra.mxu0 %v1440_v59 }
  0x38   :  { %1295 = vmatprep.subr.bf16.mxu0 %v1443_v62 }
  0x39   :  { %1316 = vmatpush3.bf16.msra.mxu1 %v1442_v61 }
  0x3a   :  { %1317 = vmatprep.subr.bf16.mxu1 %v1445_v0 }
  0x3b   :  { %1296 = vmatpush3.bf16.msra.mxu0 %v1444_v63 }
  0x3c   :  { %1297 = vmatprep.subr.bf16.mxu0 %v1447_v2 }
  0x3d   :  { %1318 = vmatpush3.bf16.msra.mxu1 %v1446_v1 }
  0x3e   :  { %1319 = vmatprep.subr.bf16.mxu1 %v1449_v4 }
  0x3f   :  { %1298 = vmatpush3.bf16.msra.mxu0 %v1448_v3 }
  0x40   :  { %838 = vmatprep.subr.bf16.mxu0 %v1510_v9 }
  0x41   :  { %1320 = vmatpush3.bf16.msra.mxu1 %v1452_v8 }
  0x42   :  { %791 = vmatmul.mubr.bf16.vlgmr.msra.gmra.mrb[4].mxu0 %v1139_v6 }
  0x43   :  { %839 = vmatpush1.bf16.msra.mxu0 %v1455_v13  ;;  %1220 = vmatprep.mubr.msk.bf16.mxu0 %vm674_vm0, %v1144_v18 }
  0x44   :  { %831 = vmatmul.mubr.bf16.vlgmr.msra.gmra.mrb[4].mxu1 %v1141_v11  ;;  %840 = vmatprep.subr.bf16.mxu0 %v1510_v9 }
  0x47   :  { %841 = vmatpush1.bf16.msra.mxu0 %v1456_v14 }
  0x48   :  { %842 = vmatprep.subr.bf16.mxu0 %v1510_v9 }
  0x4b   :  { %843 = vmatpush1.bf16.msra.mxu0 %v1457_v15 }
  0x4c   :  { %844 = vmatprep.subr.bf16.mxu0 %v1510_v9 }
  0x4f   :  { %845 = vmatpush1.bf16.msra.mxu0 %v1458_v16 }
  0x50   :  { %846 = vmatprep.subr.bf16.mxu0 %v1510_v9 }
  0x53   :  { %847 = vmatpush1.bf16.msra.mxu0 %v1459_v19 }
  0x54   :  { %848 = vmatprep.subr.bf16.mxu0 %v1510_v9 }
  0x55   :  { %12 = vsyncpa [#allocation3], 0  ;;  %v1461_v21 = vld [vmem:[%s1880_s1 + $0x230] sm:$0xff]   ;;  %v1462_v22 = vld [vmem:[%s1880_s1 + $0x238] sm:$0xff]   ;;  %v1143_v26 = vcombine.low %v32_v17, %v32_v17  ;;  %v1511_v28 = vmov 0.0   ;;  %vm950_vm1 = vcmask 1045504  }
  0x56   :  { %v1463_v23 = vld [vmem:[%s1880_s1 + $0x240] sm:$0xff]   ;;  %v1464_v24 = vld [vmem:[%s1880_s1 + $0x248] sm:$0xff]   ;;  %v1465_v25 = vld [vmem:[%s1880_s1 + $0x250] sm:$0xff]   ;;  %1343 = vmatprep.subr.bf16.mxu1 %v1511_v28  ;;  %vm1512_vm2 = vmmov 0   ;;  %vm946_vm3 = vcmask 883712  }
  0x57   :  { %849 = vmatpush1.bf16.msra.mxu0 %v1460_v20  ;;  %v1468_v27 = vld [vmem:[%s1882_s3] sm:$0xff]   ;;  %v1469_v29 = vld [vmem:[%s1882_s3 + $0x8] sm:$0xff]   ;;  %v1470_v30 = vld [vmem:[%s1882_s3 + $0x10] sm:$0xff]   ;;  %1357 = vmatprep.mubr.msk.bf16.mxu1 %vm1512_vm2, %v1511_v28 }
  0x58   :  { %850 = vmatprep.subr.bf16.mxu0 %v1510_v9  ;;  %1344 = vmatpush3.bf16.msra.mxu1 %v1468_v27  ;;  %v1471_v31 = vld [vmem:[%s1882_s3 + $0x18] sm:$0xff]   ;;  %v1472_v32 = vld [vmem:[%s1882_s3 + $0x20] sm:$0xff]   ;;  %v1473_v33 = vld [vmem:[%s1882_s3 + $0x28] sm:$0xff]  }
  0x59   :  { %1345 = vmatprep.subr.bf16.mxu1 %v1511_v28  ;;  %v1474_v34 = vld [vmem:[%s1882_s3 + $0x30] sm:$0x3f]   ;;  %v1134_v37 = vld [vmem:[%s1881_s2] ss:$0 sm:$0xff]  ;;  %v1478_v11 = vld [vmem:[%s1884_s5 + $0x18] sm:$0xff]  }
  0x5a   :  { %v952_v35 = vsel %vm950_vm1, %v1474_v34, 0  ;;  %v1475_v7 = vld [vmem:[%s1884_s5] sm:$0xff]   ;;  %v1477_v10 = vld [vmem:[%s1884_s5 + $0x10] sm:$0xff]   ;;  %v1480_v13 = vld [vmem:[%s1884_s5 + $0x28] sm:$0xff]  }
  0x5b   :  { %851 = vmatpush1.bf16.msra.mxu0 %v1461_v21  ;;  %v1479_v12 = vld [vmem:[%s1884_s5 + $0x20] sm:$0xff]   ;;  %v1481_v14 = vld [vmem:[%s1884_s5 + $0x30] sm:$0x3f]  }
  0x5c   :  { %852 = vmatprep.subr.bf16.mxu0 %v1510_v9  ;;  %1346 = vmatpush3.bf16.msra.mxu1 %v1469_v29  ;;  %v1066_v15 = vsel %vm950_vm1, %v1481_v14, 0  ;;  %v1221_v16 = vld [vmem:[%s1883_s4] ss:$0 sm:$0xff]  ;;  %s1513_s4 = smov [#allocation2]  }
  0x5d   :  { %1347 = vmatprep.subr.bf16.mxu1 %v1511_v28  ;;  %s1126_s27 = sshll.u32 %s1513_s4, 4  ;;  %s1127_s27 = int_to_ptr.vmem [resolvable:$true] %s1126_s27 }
  0x5e   :  { %p1491_p1 = scmp.lt.s32.totalorder %s1127_s27, %s1127_s27 }
  0x5f   :  { %853 = vmatpush1.bf16.msra.mxu0 %v1462_v22 }
  0x60   :  { %854 = vmatprep.subr.bf16.mxu0 %v1510_v9  ;;  %1348 = vmatpush3.bf16.msra.mxu1 %v1470_v30 }
  0x61   :  { %1349 = vmatprep.subr.bf16.mxu1 %v1511_v28 }
  0x63   :  { %855 = vmatpush1.bf16.msra.mxu0 %v1463_v23 }
  0x64   :  { %856 = vmatprep.subr.bf16.mxu0 %v1510_v9  ;;  %1350 = vmatpush3.bf16.msra.mxu1 %v1471_v31 }
  0x65   :  { %1351 = vmatprep.subr.bf16.mxu1 %v1511_v28 }
  0x67   :  { %857 = vmatpush1.bf16.msra.mxu0 %v1464_v24 }
  0x68   :  { %858 = vmatprep.subr.bf16.mxu0 %v1510_v9  ;;  %1352 = vmatpush3.bf16.msra.mxu1 %v1472_v32  ;;  %v1476_v9 = vld [vmem:[%s1884_s5 + $0x8] sm:$0xff]  }
  0x69   :  { %1353 = vmatprep.subr.bf16.mxu1 %v1511_v28 }
  0x6b   :  { %859 = vmatpush1.bf16.msra.mxu0 %v1465_v25 }
  0x6c   :  { %1354 = vmatpush3.bf16.msra.mxu1 %v1473_v33 }
  0x6d   :  { %1355 = vmatprep.subr.bf16.mxu1 %v1511_v28 }
  0x6e   :  { %871 = vmatmul.mubr.bf16.vlgmr.msra.gmra.mrb[8].mxu0 %v1143_v26 }
  0x70   :  { %1356 = vmatpush3.bf16.msra.mxu1 %v952_v35 }
  0x71   :  { %1361 = vmatprep.subr.bf16.mxu1 %v1511_v28 }
  0xf5   :  { %v1255_v36 = vpop.f32.mrb[0].mxu0 }
  0xf6   :  { %v1256_v38 = vpop.f32.mrb[1].mxu0 }
  0xf7   :  { %v1257_v39 = vadd.f32 %v1256_v38, %v1255_v36  ;;  %v1258_v40 = vpop.f32.mrb[2].mxu0  ;;  %v1277_v41 = vpop.f32.mrb[0].mxu1 }
  0xf8   :  { %v1259_v42 = vpop.f32.mrb[3].mxu0  ;;  %v1278_v43 = vpop.f32.mrb[1].mxu1 }
  0xf9   :  { %v713_v44 = vadd.f32 %v1257_v39, %v1134_v37  ;;  %v1279_v45 = vadd.f32 %v1278_v43, %v1277_v41  ;;  %v1280_v46 = vpop.f32.mrb[2].mxu1 }
  0xfa   :  { %v1281_v47 = vpop.f32.mrb[3].mxu1 }
  0xfb   :  { %v753_v48 = vadd.f32 %v1279_v45, %v713_v44 }
 0x115   :  { %v1299_v49 = vpop.f32.mrb[4].mxu0 }
 0x116   :  { %v1300_v50 = vpop.f32.mrb[5].mxu0 }
 0x117   :  { %v1301_v51 = vadd.f32 %v1300_v50, %v1299_v49  ;;  %v1302_v52 = vpop.f32.mrb[6].mxu0  ;;  %v1321_v53 = vpop.f32.mrb[4].mxu1 }
 0x118   :  { %v1303_v54 = vpop.f32.mrb[7].mxu0  ;;  %v1322_v55 = vpop.f32.mrb[5].mxu1 }
 0x119   :  { %v793_v56 = vadd.f32 %v1301_v51, %v753_v48  ;;  %v1323_v57 = vadd.f32 %v1322_v55, %v1321_v53  ;;  %v1324_v58 = vpop.f32.mrb[6].mxu1 }
 0x11a   :  { %v1325_v59 = vpop.f32.mrb[7].mxu1 }
 0x11b   :  { %v833_v60 = vadd.f32 %v1323_v57, %v793_v56 }
 0x141   :  { %v872_v61 = vpop.f32.mrb[8].mxu0 }
 0x142   :  { %v873_v62 = vadd.f32 %v872_v61, %v833_v60  ;;  %v874_v63 = vpop.f32.mrb[9].mxu0 }
 0x143   :  { %v875_v0 = vpop.f32.mrb[10].mxu0 }
 0x144   :  { %v878_v1 = vadd.f32 3.0, %v873_v62  ;;  %v876_v2 = vpop.f32.mrb[11].mxu0 }
 0x146   :  { %v879_v3 = vmax.f32 %v878_v1, 0.0 }
 0x148   :  { %v880_v4 = vmin.f32 %v879_v3, 6.0 }
 0x14a   :  { %v881_v5 = vmul.f32 0.16666667, %v880_v4 }
 0x14c   :  { %v882_v6 = vmul.f32 %v881_v5, %v873_v62 }
 0x14e   :  { %v883_v8 = vpack.c.bf16 %v882_v6, %v882_v6 }
 0x150   :  { %1358 = vmatmul.mubr.msk.bf16.vlgmr.msra.gmra.mrb[8].mxu1 %vm946_vm3, %v883_v8 }
 0x151   :  { %1362 = vmatpush3.bf16.msra.mxu1 %v1475_v7  ;;  %1375 = vmatprep.mubr.msk.bf16.mxu1 %vm1512_vm2, %v1511_v28 }
 0x152   :  { %1363 = vmatprep.subr.bf16.mxu1 %v1511_v28 }
 0x155   :  { %1364 = vmatpush3.bf16.msra.mxu1 %v1476_v9 }
 0x156   :  { %1365 = vmatprep.subr.bf16.mxu1 %v1511_v28 }
 0x159   :  { %1366 = vmatpush3.bf16.msra.mxu1 %v1477_v10 }
 0x15a   :  { %1367 = vmatprep.subr.bf16.mxu1 %v1511_v28 }
 0x15d   :  { %1368 = vmatpush3.bf16.msra.mxu1 %v1478_v11 }
 0x15e   :  { %1369 = vmatprep.subr.bf16.mxu1 %v1511_v28 }
 0x161   :  { %1370 = vmatpush3.bf16.msra.mxu1 %v1479_v12 }
 0x162   :  { %1371 = vmatprep.subr.bf16.mxu1 %v1511_v28 }
 0x165   :  { %1372 = vmatpush3.bf16.msra.mxu1 %v1480_v13 }
 0x166   :  { %1373 = vmatprep.subr.bf16.mxu1 %v1511_v28  ;;  %v1230_v28 = vld [vmem:[%s1885_s6] ss:$0 sm:$0xff]  ;;  %s1486_s6 = scalar_lea.vmem %s1127_s27, 128 }
 0x167   :  { %p1487_p0 = scmp.ne.s32.totalorder %s1127_s27, %s1486_s6  ;;  %p1492_p2 = scmp.lt.s32.totalorder %s1486_s6, %s1486_s6 }
 0x169   :  { %1374 = vmatpush3.bf16.msra.mxu1 %v1066_v15  ;;  %p1493_p3 = por %p1492_p2, %p1491_p1 }
 0x16b   :  { %p1494_p4 = pnand %p1493_p3, %p1487_p0 }
 0x223   :  { %v988_v17 = vpop.f32.mrb[8].mxu1 }
 0x224   :  { %v989_v18 = vadd.f32 %v1221_v16, %v988_v17  ;;  %v1359_v19 = vpop.f32.mrb[9].mxu1 }
 0x225   :  { %v991_v20 = vpop.f32.mrb[10].mxu1 }
 0x226   :  { %v994_v21 = vadd.f32 3.0, %v989_v18  ;;  %v1360_v22 = vpop.f32.mrb[11].mxu1 }
 0x228   :  { %v995_v23 = vmax.f32 %v994_v21, 0.0 }
 0x22a   :  { %v996_v24 = vmin.f32 %v995_v23, 6.0 }
 0x22c   :  { %v997_v25 = vmul.f32 0.16666667, %v996_v24 }
 0x22e   :  { %v998_v26 = vmul.f32 %v997_v25, %v989_v18 }
 0x230   :  { %v999_v27 = vpack.c.bf16 %v998_v26, %v998_v26 }
 0x232   :  { %1376 = vmatmul.mubr.msk.bf16.vlgmr.msra.gmra.mrb[12].mxu1 %vm946_vm3, %v999_v27 }
 0x305   :  { %v1102_v29 = vpop.f32.mrb[12].mxu1 }
 0x306   :  { %v1103_v30 = vadd.f32 %v1230_v28, %v1102_v29  ;;  %v1377_v31 = vpop.f32.mrb[13].mxu1 }
 0x307   :  { %v1105_v32 = vpop.f32.mrb[14].mxu1 }
 0x308   :  { %1108 = vmax.xlane.f32.xlu0 %v1103_v30  ;;  %v1378_v33 = vpop.f32.mrb[15].mxu1 }
 0x395   :  { %v1109_v34 = vpop.xlane.xlu0 %1108 }
 0x396   :  { %v1110_v35 = vsub.f32 %v1103_v30, %v1109_v34 }
 0x398   :  { %v1111_v36 = vmul.f32 1.442695, %v1110_v35 }
 0x39a   :  { %1482 = vpow2.f32 %v1111_v36 }
 0x3a4   :  { %v1483_v37 = vpop.eup %1482 }
 0x3a5   :  { %1113 = vadd.xlane.f32.xlu0 %v1483_v37 }
 0x432   :  { %v1114_v38 = vpop.xlane.xlu0 %1113 }
 0x433   :  { %1484 = vlog2.f32 %v1114_v38 }
 0x43d   :  { %v1485_v39 = vpop.eup %1484 }
 0x43e   :  { %v1116_v40 = vmul.f32 0.6931472, %v1485_v39 }
 0x440   :  { %v1117_v41 = vadd.f32 %v1116_v40, %v1109_v34 }
 0x442   :  { %v1118_v42 = vsub.f32 %v1103_v30, %v1117_v41 }
 0x444   :  { %1119 = vst [vmem:[#allocation2] sm:$0xff] %v1118_v42 }
 0x445   :  { %1497 = shalt.err (!%p1494_p4)
}
 0x446   :  { %s1498_s30 = scalar_lea.hbm %s1886_s7, 128 }
 0x447   :  { %p1499_p5 = scmp.ne.s32.totalorder %s1886_s7, %s1498_s30  ;;  %p1502_p6 = scmp.lt.u32.totalorder %s1498_s30, %s1886_s7 }
 0x449   :  { %p1504_p7 = pnand %p1502_p6, %p1499_p5 }
 0x44b   :  { %1507 = shalt.err (!%p1504_p7)
}
 0x44c   :  { %1129 = dma.vmem_to_hbm [thread:$0]  %s1127_s27, 128, %s1886_s7, [#allocation3]  }
 0x44d   :  { %1508 = dma.done.wait [#allocation3], 128  }
 0x44e   :  { %1509 = vsyncadd [#allocation3], 4294967168 }
 0x44f   :  { %1133 = vsyncpa [#allocation3], 1 }

</bundles_post_ra>
